<compile_context>
chip_gen: v7x
topology: tpu7x:2x2x1
jax: 0.10.0
libtpu: 0.0.40
codegen_flags: <defaults>
</compile_context>

<pallas_src>
import math

import jax
import jax.numpy as jnp
from jax.experimental import pallas as pl
from jax.experimental.pallas import tpu as pltpu


# ---------------------------------------------------------------------------
# Kernel
# ---------------------------------------------------------------------------
def _make_mlp_kernel(num_layers, compute_dtype):
    """Kernel body: x_ref, w_0..w_{L-1}, b_last, o_ref."""

    def kernel(*refs):
        x_ref = refs[0]
        w_refs = refs[1:1 + num_layers]
        b_ref = refs[1 + num_layers]
        o_ref = refs[2 + num_layers]

        h = x_ref[...]                                   # (block, dim_in) f32
        for l in range(num_layers):
            # bf16 matmul inputs, f32 accumulation on the MXU.
            acc = jnp.dot(h.astype(compute_dtype), w_refs[l][...],
                          preferred_element_type=jnp.float32)
            if l != num_layers - 1:
                h = jnp.maximum(acc, 0.0)                # F.relu; stay f32 between layers
            else:
                acc = acc + b_ref[...].astype(jnp.float32)   # bias only on last layer
                o_ref[...] = acc.astype(o_ref.dtype)         # store in x.dtype directly

    return kernel


# ---------------------------------------------------------------------------
# Param preparation (hoisted out of the forward call: runs once per model)
# ---------------------------------------------------------------------------
def _round_up(x, m):
    return ((x + m - 1) // m) * m


def prepare_mlp_params(weights, bias_last, compute_dtype=jnp.bfloat16):
    """Pad only the *hidden* feature dims to 128 lanes and cast weights once.

    dim_in / dim_out stay unpadded so the HBM-streamed x / output keep their
    original width; hidden activations live only in VMEM, so padding them to
    128 lanes keeps all matmuls lane-dense and is numerically exact.
    """
    num_layers = len(weights)
    padded = []
    for l, w in enumerate(weights):
        in_d, out_d = w.shape
        ip = in_d if l == 0 else _round_up(in_d, 128)
        op = out_d if l == num_layers - 1 else _round_up(out_d, 128)
        w_p = jnp.pad(w, ((0, ip - in_d), (0, op - out_d)))
        padded.append(w_p.astype(compute_dtype))
    bias = bias_last.astype(jnp.float32)                 # (1, dim_out), unpadded
    return tuple(padded), bias


# ---------------------------------------------------------------------------
# Forward wrapper
# ---------------------------------------------------------------------------
def mlp_forward(x, w_padded, bias, *, block_rows=2048, compute_dtype=jnp.bfloat16):
    """Run the MLP forward pass with a Pallas TPU kernel.

    Args:
      x:         (N, dim_in) activations (any float dtype; output matches it).
      w_padded:  weights from prepare_mlp_params(), (in_l, out_l) with hidden
                 dims padded to 128.
      bias:      (1, dim_out) f32 bias of the final layer.
    Returns:
      (N, dim_out) output, same dtype as x.
    """
    num_layers = len(w_padded)
    n, dim_in = x.shape
    dim_out = w_padded[-1].shape[1]

    # Row block: large enough (multiple of 128) to amortize the ~0.35us per-step
    # overhead, but chosen so the grid has >= 2 steps when possible so both v7x
    # TensorCores get work.  Tail blocks are handled by Pallas (partial DMA),
    # no row-padding copy of x.
    half = -(-n // 2)
    block = min(block_rows, _round_up(half, 128))
    if block >= n:
        block = n                                    # single full block (== full dim)
    grid = pl.cdiv(n, block)

    # x / output stream with their true (unpadded) last dim == full array dim.
    in_specs = [pl.BlockSpec((block, dim_in), lambda i: (i, 0))]
    for w in w_padded:                               # weights/bias fully VMEM-resident
        in_specs.append(pl.BlockSpec(w.shape, lambda i: (0, 0)))
    in_specs.append(pl.BlockSpec(bias.shape, lambda i: (0, 0)))
    out_spec = pl.BlockSpec((block, dim_out), lambda i: (i, 0))

    # Real traffic estimate: streamed x + output + (small, resident) weights.
    xb = jnp.dtype(x.dtype).itemsize
    w_bytes = sum(int(w.size) * jnp.dtype(w.dtype).itemsize for w in w_padded)
    flops = 2 * n * sum(int(w.shape[0]) * int(w.shape[1]) for w in w_padded)
    cost = pl.CostEstimate(
        flops=flops,
        transcendentals=0,
        bytes_accessed=n * dim_in * xb + n * dim_out * xb + w_bytes,
    )

    kernel = _make_mlp_kernel(num_layers, compute_dtype)
    fn = pl.pallas_call(
        kernel,
        out_shape=jax.ShapeDtypeStruct((n, dim_out), x.dtype),
        grid_spec=pltpu.PrefetchScalarGridSpec(
            num_scalar_prefetch=0,
            grid=(grid,),
            in_specs=in_specs,
            out_specs=out_spec,
        ),
        compiler_params=pltpu.CompilerParams(
            dimension_semantics=("parallel",)),      # megacore sharding on v7x
        cost_estimate=cost,
    )
    return fn(x, *w_padded, bias)


# ---------------------------------------------------------------------------
# Params / reference
# ---------------------------------------------------------------------------
def init_mlp_params(key, dim_in, dim_out, dim_hidden, num_layers):
    """Deterministic Kaiming-uniform init matching MLP._init_weights.

    Returns weights as (in, out) matrices (transposed vs. torch's (out, in))
    and the zero bias of the final layer.
    """
    weights = []
    for l in range(num_layers):
        fan_in = dim_in if l == 0 else dim_hidden
        fan_out = dim_out if l == num_layers - 1 else dim_hidden
        # torch.nn.init.kaiming_uniform_(w, nonlinearity='relu'):
        #   gain = sqrt(2), bound = gain * sqrt(3 / fan_in) = sqrt(6 / fan_in)
        bound = math.sqrt(6.0 / fan_in)
        key, sub = jax.random.split(key)
        w = jax.random.uniform(sub, (fan_in, fan_out),
                               minval=-bound, maxval=bound,
                               dtype=jnp.float32)
        weights.append(w)
    bias_last = jnp.zeros((1, dim_out), dtype=jnp.float32)  # .fill_(0.0)
    return weights, bias_last


def mlp_reference(x, weights, bias_last):
    """Pure-JAX f32 reference of the same forward pass."""
    h = x
    num_layers = len(weights)
    for l in range(num_layers):
        h = h @ weights[l]
        if l != num_layers - 1:
            h = jnp.maximum(h, 0.0)
    return h + bias_last


# ---------------------------------------------------------------------------
# Main
# ---------------------------------------------------------------------------
if __name__ == "__main__":
    # Small shapes consistent with the module: N points with dim_in features.
    dim_in, dim_out, dim_hidden, num_layers = 8, 8, 32, 3
    batch = 1000   # not a multiple of the row block: exercises the partial tail block

    key = jax.random.PRNGKey(0)
    key, kx = jax.random.split(key)
    x = jax.random.normal(kx, (batch, dim_in), dtype=jnp.float32)

    weights, bias_last = init_mlp_params(key, dim_in, dim_out,
                                         dim_hidden, num_layers)
    # Weight padding / bf16 cast done once, outside the forward call.
    w_padded, bias = prepare_mlp_params(weights, bias_last)

    out = mlp_forward(x, w_padded, bias, block_rows=2048)
    out = jax.block_until_ready(out)

    ref = mlp_reference(x, weights, bias_last)
    assert out.shape == (batch, dim_out)
    assert out.dtype == x.dtype
    # bf16 matmul inputs with f32 accumulation and f32 activations/output:
    # compare with a scale-relative bound.
    err = float(jnp.max(jnp.abs(out - ref)))
    scale = float(jnp.max(jnp.abs(ref))) + 1e-6
    assert err / scale < 3e-2, f"mismatch vs reference: rel_err={err / scale}"

    print("KERNEL_OK")
</pallas_src>

<mosaic_0001>
module attributes {stable_mosaic.version = 11 : i64} {
  func.func @kernel(%arg0: i32, %arg1: memref<512x8xf32, #tpu.memory_space<vmem>>, %arg2: memref<8x128xbf16, #tpu.memory_space<vmem>>, %arg3: memref<128x128xbf16, #tpu.memory_space<vmem>>, %arg4: memref<128x8xbf16, #tpu.memory_space<vmem>>, %arg5: memref<1x8xf32, #tpu.memory_space<vmem>>, %arg6: memref<512x8xf32, #tpu.memory_space<vmem>>) attributes {dimension_semantics = [#tpu.dimension_semantics<parallel>], iteration_bounds = array<i64: 2>, scalar_prefetch = 0 : i64, scratch_operands = 0 : i64, tpu.core_type = #tpu.core_type<tc>, window_params = [{transform_indices = @transform_0, window_bounds = array<i64: 512, 8>}, {pipeline_mode = #tpu.pipeline_mode<synchronous>, transform_indices = @transform_1, window_bounds = array<i64: 8, 128>}, {pipeline_mode = #tpu.pipeline_mode<synchronous>, transform_indices = @transform_2, window_bounds = array<i64: 128, 128>}, {pipeline_mode = #tpu.pipeline_mode<synchronous>, transform_indices = @transform_3, window_bounds = array<i64: 128, 8>}, {pipeline_mode = #tpu.pipeline_mode<synchronous>, transform_indices = @transform_4, window_bounds = array<i64: 1, 8>}, {transform_indices = @transform_5, window_bounds = array<i64: 512, 8>}]} {
    %c0 = arith.constant 0 : index
    %c0_0 = arith.constant 0 : index
    %0 = vector.load %arg1[%c0, %c0_0] : memref<512x8xf32, #tpu.memory_space<vmem>>, vector<512x8xf32>
    %1 = arith.truncf %0 : vector<512x8xf32> to vector<512x8xbf16>
    %c0_1 = arith.constant 0 : index
    %c0_2 = arith.constant 0 : index
    %2 = vector.load %arg2[%c0_1, %c0_2] : memref<8x128xbf16, #tpu.memory_space<vmem>>, vector<8x128xbf16>
    %cst = arith.constant dense<0.000000e+00> : vector<512x128xf32>
    %3 = tpu.matmul %1, %2, %cst {dimension_numbers = #tpu.dot_dimension_numbers<[1], [0], [0], [1], [0, 0, 1, 1], [], []>} : vector<512x8xbf16>, vector<8x128xbf16>, vector<512x128xf32> -> vector<512x128xf32>
    %cst_3 = arith.constant 0.000000e+00 : f32
    %4 = vector.broadcast %cst_3 : f32 to vector<512x128xf32>
    %5 = arith.maximumf %3, %4 : vector<512x128xf32>
    %6 = arith.truncf %5 : vector<512x128xf32> to vector<512x128xbf16>
    %c0_4 = arith.constant 0 : index
    %c0_5 = arith.constant 0 : index
    %7 = vector.load %arg3[%c0_4, %c0_5] : memref<128x128xbf16, #tpu.memory_space<vmem>>, vector<128x128xbf16>
    %cst_6 = arith.constant dense<0.000000e+00> : vector<512x128xf32>
    %8 = tpu.matmul %6, %7, %cst_6 {dimension_numbers = #tpu.dot_dimension_numbers<[1], [0], [0], [1], [0, 0, 1, 1], [], []>} : vector<512x128xbf16>, vector<128x128xbf16>, vector<512x128xf32> -> vector<512x128xf32>
    %cst_7 = arith.constant 0.000000e+00 : f32
    %9 = vector.broadcast %cst_7 : f32 to vector<512x128xf32>
    %10 = arith.maximumf %8, %9 : vector<512x128xf32>
    %11 = arith.truncf %10 : vector<512x128xf32> to vector<512x128xbf16>
    %c0_8 = arith.constant 0 : index
    %c0_9 = arith.constant 0 : index
    %12 = vector.load %arg4[%c0_8, %c0_9] : memref<128x8xbf16, #tpu.memory_space<vmem>>, vector<128x8xbf16>
    %cst_10 = arith.constant dense<0.000000e+00> : vector<512x8xf32>
    %13 = tpu.matmul %11, %12, %cst_10 {dimension_numbers = #tpu.dot_dimension_numbers<[1], [0], [0], [1], [0, 0, 1, 1], [], []>} : vector<512x128xbf16>, vector<128x8xbf16>, vector<512x8xf32> -> vector<512x8xf32>
    %c0_11 = arith.constant 0 : index
    %c0_12 = arith.constant 0 : index
    %14 = vector.load %arg5[%c0_11, %c0_12] : memref<1x8xf32, #tpu.memory_space<vmem>>, vector<1x8xf32>
    %15 = vector.broadcast %14 : vector<1x8xf32> to vector<512x8xf32>
    %16 = arith.addf %13, %15 : vector<512x8xf32>
    %c0_13 = arith.constant 0 : index
    %c0_14 = arith.constant 0 : index
    %17 = vector.load %arg6[%c0_13, %c0_14] : memref<512x8xf32, #tpu.memory_space<vmem>>, vector<512x8xf32>
    tpu.vector_store %arg6[%c0_13, %c0_14], %16 {strides = array<i32>} : memref<512x8xf32, #tpu.memory_space<vmem>>, vector<512x8xf32>,
    return
  }
  func.func @transform_0(%arg0: i32) -> (i32, i32) {
    %c0_i32 = arith.constant 0 : i32
    %c0_i32_0 = arith.constant 0 : i32
    return %arg0, %c0_i32 : i32, i32
  }
  func.func @transform_1(%arg0: i32) -> (i32, i32) {
    %c0_i32 = arith.constant 0 : i32
    %c0_i32_0 = arith.constant 0 : i32
    %c0_i32_1 = arith.constant 0 : i32
    return %c0_i32, %c0_i32_0 : i32, i32
  }
  func.func @transform_2(%arg0: i32) -> (i32, i32) {
    %c0_i32 = arith.constant 0 : i32
    %c0_i32_0 = arith.constant 0 : i32
    %c0_i32_1 = arith.constant 0 : i32
    return %c0_i32, %c0_i32_0 : i32, i32
  }
  func.func @transform_3(%arg0: i32) -> (i32, i32) {
    %c0_i32 = arith.constant 0 : i32
    %c0_i32_0 = arith.constant 0 : i32
    %c0_i32_1 = arith.constant 0 : i32
    return %c0_i32, %c0_i32_0 : i32, i32
  }
  func.func @transform_4(%arg0: i32) -> (i32, i32) {
    %c0_i32 = arith.constant 0 : i32
    %c0_i32_0 = arith.constant 0 : i32
    %c0_i32_1 = arith.constant 0 : i32
    return %c0_i32, %c0_i32_0 : i32, i32
  }
  func.func @transform_5(%arg0: i32) -> (i32, i32) {
    %c0_i32 = arith.constant 0 : i32
    %c0_i32_0 = arith.constant 0 : i32
    return %arg0, %c0_i32 : i32, i32
  }
}

</mosaic_0001>

<bundles_post_ra>
// kernel: tpu_custom_call.1
= control target key start
LH: loop header
LB: loop body
LE: loop exit
PB: predicated region body
PF: predicated region fallthrough
CT: control target
= control target key end

     0   :  { %s2811_s18 = smov 0   ;;  %s2813_s19 = smov 0   ;;  %s3433_s0 = inlined_call_operand.vmem [shape: f32[1000,8], index: 0, kind: input, shape index: {}]   ;;  %s3434_s1 = inlined_call_operand.vmem [shape: bf16[8,128], index: 1, kind: input, shape index: {}]   ;;  %s3435_s2 = inlined_call_operand.vmem [shape: bf16[128,128], index: 2, kind: input, shape index: {}]   ;;  %s3436_s3 = inlined_call_operand.vmem [shape: bf16[128,8], index: 3, kind: input, shape index: {}]   ;;  %s3437_s4 = inlined_call_operand.vmem [shape: f32[1,8], index: 4, kind: input, shape index: {}]   ;;  %s3438_s5 = inlined_call_operand.vmem [shape: f32[1000,8], index: 5, kind: output, shape index: {}]  }
   0x1   :  { %s2815_s20 = smov 0  }
   0x2 LB: > { %s2824_s21 = sadd.s32 4294967295, %s2747_s20   ;;  %s2826_s22 = sadd.s32 1, %s2747_s20   ;;  %s2747_s20 = sphi %s2815_s20, %s3447_s20   ;;  %s2743_s19 = sphi %s2813_s19, %s3446_s19   ;;  %s2739_s18 = sphi %s2811_s18, %s3445_s18  }
   0x3   : > { %s129_s23 = ssub.s32 %s2747_s20, %s2826_s22  ;;  %s132_s24 = sadd.s32 1, %s2743_s19 }
   0x4   : > { %p130_p0 = scmp.eq.s32.totalorder %s129_s23, 0  ;;  %p142_p1 = scmp.ne.s32.totalorder %s2743_s19, %s2739_s18 }
   0x5   : > { %p143_p2 = scmp.eq.s32.totalorder %s2824_s21, 1  ;;  %p2173_p3 = scmp.ge.s32.totalorder %s2747_s20, 1 }
   0x6   : > { %s2834_s25 = scalar_select %p130_p0, %s2743_s19, %s132_s24  }
   0x7   : > { %p2836_p4 = por %p143_p2, %p142_p1  ;;  %p196_p5 = scmp.lt.s32.totalorder %s2747_s20, 3 }
   0x9   : > { %p197_p6 = pnand %p2173_p3, %p196_p5 }
   0xa   : > { %v343_v0 = vld [vmem:[%s3434_s1] sm:$0xf] (!%p197_p6)  ;;  %vm441_vm0 = vcmask (!%p197_p6), 1043456   ;;  %s2844_s29 = sshll.u32 (!%p197_p6), %s2824_s21, 6  ;;  %vm344_vm1 = vcmask (!%p197_p6), 64512   ;;  %v2678_v29 = vld [vmem:[%s3435_s2 + $0x8] sm:$0xff] (!%p197_p6)  }
   0xb   : > { %200 = sbr.rel (%p197_p6) target bundleno = 876 (0x36c), region = 40  ;;  %v2677_v1 = vld [vmem:[%s3435_s2] sm:$0xff] (!%p197_p6)   ;;  %2587 = vmatprep.subr.msk.bf16.mxu0 (!%p197_p6), %vm441_vm0, %v343_v0  ;;  %v443_v2 = vsel (!%p197_p6), %vm441_vm0, %v343_v0, 0  ;;  %p232_p7 = scmp.lt.s32.totalorder (!%p197_p6), %s2844_s29, 124  ;;  %2588 = vmatprep.subr.msk.bf16.mxu1 (!%p197_p6), %vm441_vm0, %v343_v0  ;;  %v2679_v38 = vld [vmem:[%s3435_s2 + $0x10] sm:$0xff] (!%p197_p6)   ;;  %v2680_v40 = vld [vmem:[%s3435_s2 + $0x18] sm:$0xff] (!%p197_p6)  }
   0xc   : > { %2360 = vmatpush3.bf16.msra.mxu0 (!%p197_p6), %v443_v2  ;;  %2586 = vmatpush3.bf16.msra.mxu1 (!%p197_p6), %v443_v2  ;;  %v2681_v50 = vld [vmem:[%s3435_s2 + $0x20] sm:$0xff] (!%p197_p6)   ;;  %v2682_v57 = vld [vmem:[%s3435_s2 + $0x28] sm:$0xff] (!%p197_p6)   ;;  %v2683_v2 = vld [vmem:[%s3435_s2 + $0x30] sm:$0xff] (!%p197_p6)   ;;  %s224_s6 = sand.u32 (!%p197_p6), 1, %s2739_s18  }
   0xd   : > { %2425 = vmatprep.subr.bf16.mxu1 (!%p197_p6), %v2677_v1 }
  0x12   : > { %s233_s7 = scalar_select %p232_p7, %s2844_s29, 124 }
  0x13   : > { %s1711_s18 = ssub.s32 (%p2836_p4), 125, %s2844_s29  ;;  %s2243_s12 = sshll.u32 (%p2836_p4), %s2824_s21, 9 }
  0x14   : > { %s2176_s8 = sshll.u32 %s233_s7, 3  ;;  %s2174_s7 = sshll.u32 %s224_s6, 9 }
  0x15   : > { %s2854_s11 = scalar_lea.vmem %s3433_s0, %s2176_s8  ;;  %s3035_s10 = scalar_lea.vmem [#allocation2], %s2174_s7  }
  0x16   : > { %v247_v3 = vld [vmem:[%s2854_s11] sm:$0xff]  ;;  %v248_v4 = vld [vmem:[%s2854_s11 + $0x8] sm:$0xff]  ;;  %v249_v5 = vld [vmem:[%s2854_s11 + $0x10] sm:$0xff]  ;;  %p1712_p8 = scmp.lt.s32.totalorder (%p2836_p4), %s1711_s18, 64  ;;  %s3234_s14 = scalar_lea.vmem (%p2836_p4), %s3438_s5, %s2243_s12  }
  0x17   : > { %v311_v6 = vpack.c.bf16 %v248_v4, %v247_v3  ;;  %v250_v7 = vld [vmem:[%s2854_s11 + $0x18] sm:$0xff]  ;;  %v251_v8 = vld [vmem:[%s2854_s11 + $0x20] sm:$0xff]  ;;  %v252_v9 = vld [vmem:[%s2854_s11 + $0x28] sm:$0xff] }
  0x18   : > { %v312_v10 = vpack.c.bf16 %v250_v7, %v249_v5  ;;  %v313_v11 = vpack.c.bf16 %v252_v9, %v251_v8  ;;  %v253_v12 = vld [vmem:[%s2854_s11 + $0x30] sm:$0xff]  ;;  %v254_v13 = vld [vmem:[%s2854_s11 + $0x38] sm:$0xff]  ;;  %v255_v14 = vld [vmem:[%s2854_s11 + $0x40] sm:$0xff] }
  0x19   : > { %2361 = vmatprep.mubr.msk.bf16.mxu0 %vm344_vm1, %v311_v6  ;;  %v256_v15 = vld [vmem:[%s2854_s11 + $0x48] sm:$0xff]  ;;  %v314_v16 = vpack.c.bf16 %v254_v13, %v253_v12  ;;  %v279_v18 = vld [vmem:[%s2854_s11 + $0x100] sm:$0xff]  ;;  %v281_v20 = vld [vmem:[%s2854_s11 + $0x110] sm:$0xff] }
  0x1a   : > { %2362 = vmatmul.mubr.msk.bf16.vlgmr.msra.gmra.mrb[0].mxu0 %vm344_vm1, %v312_v10  ;;  %v315_v17 = vpack.c.bf16 %v256_v15, %v255_v14  ;;  %v280_v19 = vld [vmem:[%s2854_s11 + $0x108] sm:$0xff]  ;;  %v282_v21 = vld [vmem:[%s2854_s11 + $0x118] sm:$0xff]  ;;  %v283_v24 = vld [vmem:[%s2854_s11 + $0x120] sm:$0xff] }
  0x1b   : > { %2365 = vmatprep.mubr.msk.bf16.mxu0 %vm344_vm1, %v313_v11  ;;  %v327_v22 = vpack.c.bf16 %v280_v19, %v279_v18  ;;  %v328_v23 = vpack.c.bf16 %v282_v21, %v281_v20  ;;  %v284_v25 = vld [vmem:[%s2854_s11 + $0x128] sm:$0xff]  ;;  %v257_v26 = vld [vmem:[%s2854_s11 + $0x50] sm:$0xff]  ;;  %v258_v27 = vld [vmem:[%s2854_s11 + $0x58] sm:$0xff] }
  0x1c   : > { %v329_v28 = vpack.c.bf16 %v284_v25, %v283_v24  ;;  %v259_v30 = vld [vmem:[%s2854_s11 + $0x60] sm:$0xff]  ;;  %v260_v31 = vld [vmem:[%s2854_s11 + $0x68] sm:$0xff]  ;;  %v316_v32 = vpack.c.bf16 %v258_v27, %v257_v26  ;;  %v285_v33 = vld [vmem:[%s2854_s11 + $0x130] sm:$0xff] }
  0x1d   : > { %2393 = vmatprep.mubr.msk.bf16.mxu1 %vm344_vm1, %v327_v22  ;;  %v286_v34 = vld [vmem:[%s2854_s11 + $0x138] sm:$0xff]  ;;  %v317_v35 = vpack.c.bf16 %v260_v31, %v259_v30  ;;  %v287_v36 = vld [vmem:[%s2854_s11 + $0x140] sm:$0xff]  ;;  %v288_v37 = vld [vmem:[%s2854_s11 + $0x148] sm:$0xff] }
  0x1e   : > { %2394 = vmatmul.mubr.msk.bf16.vlgmr.msra.gmra.mrb[0].mxu1 %vm344_vm1, %v328_v23  ;;  %v330_v39 = vpack.c.bf16 %v286_v34, %v285_v33  ;;  %v261_v41 = vld [vmem:[%s2854_s11 + $0x70] sm:$0xff]  ;;  %v262_v42 = vld [vmem:[%s2854_s11 + $0x78] sm:$0xff]  ;;  %v263_v43 = vld [vmem:[%s2854_s11 + $0x80] sm:$0xff]  ;;  %v331_v44 = vpack.c.bf16 %v288_v37, %v287_v36 }
  0x1f   : > { %2397 = vmatprep.mubr.msk.bf16.mxu1 %vm344_vm1, %v329_v28  ;;  %2426 = vmatpush3.bf16.msra.mxu1 %v2677_v1  ;;  %v264_v45 = vld [vmem:[%s2854_s11 + $0x88] sm:$0xff]  ;;  %v289_v46 = vld [vmem:[%s2854_s11 + $0x150] sm:$0xff]  ;;  %v290_v47 = vld [vmem:[%s2854_s11 + $0x158] sm:$0xff]  ;;  %v318_v51 = vpack.c.bf16 %v262_v42, %v261_v41 }
  0x20   : > { %2427 = vmatprep.subr.bf16.mxu1 %v2678_v29  ;;  %v291_v48 = vld [vmem:[%s2854_s11 + $0x160] sm:$0xff]  ;;  %v292_v49 = vld [vmem:[%s2854_s11 + $0x168] sm:$0xff]  ;;  %v319_v52 = vpack.c.bf16 %v264_v45, %v263_v43  ;;  %v332_v53 = vpack.c.bf16 %v290_v47, %v289_v46  ;;  %v265_v55 = vld [vmem:[%s2854_s11 + $0x90] sm:$0xff] }
  0x21   : > { %v333_v54 = vpack.c.bf16 %v292_v49, %v291_v48  ;;  %v266_v56 = vld [vmem:[%s2854_s11 + $0x98] sm:$0xff]  ;;  %v267_v58 = vld [vmem:[%s2854_s11 + $0xa0] sm:$0xff]  ;;  %v268_v59 = vld [vmem:[%s2854_s11 + $0xa8] sm:$0xff] }
  0x22   : > { %2366 = vmatmul.mubr.msk.bf16.gmra.mrb[4].mxu0 %vm344_vm1, %v314_v16  ;;  %v320_v60 = vpack.c.bf16 %v266_v56, %v265_v55  ;;  %v293_v61 = vld [vmem:[%s2854_s11 + $0x170] sm:$0xff]  ;;  %v294_v62 = vld [vmem:[%s2854_s11 + $0x178] sm:$0xff]  ;;  %v321_v63 = vpack.c.bf16 %v268_v59, %v267_v58  ;;  %v295_v0 = vld [vmem:[%s2854_s11 + $0x180] sm:$0xff] }
  0x23   : > { %2369 = vmatprep.mubr.msk.bf16.mxu0 %vm344_vm1, %v315_v17  ;;  %2428 = vmatpush3.bf16.msra.mxu1 %v2678_v29  ;;  %v296_v1 = vld [vmem:[%s2854_s11 + $0x188] sm:$0xff]  ;;  %v334_v3 = vpack.c.bf16 %v294_v62, %v293_v61  ;;  %v269_v5 = vld [vmem:[%s2854_s11 + $0xb0] sm:$0xff]  ;;  %v270_v6 = vld [vmem:[%s2854_s11 + $0xb8] sm:$0xff] }
  0x24   : > { %2429 = vmatprep.subr.bf16.mxu1 %v2679_v38  ;;  %v335_v4 = vpack.c.bf16 %v296_v1, %v295_v0  ;;  %v271_v7 = vld [vmem:[%s2854_s11 + $0xc0] sm:$0xff]  ;;  %v272_v8 = vld [vmem:[%s2854_s11 + $0xc8] sm:$0xff]  ;;  %v322_v9 = vpack.c.bf16 %v270_v6, %v269_v5  ;;  %v297_v10 = vld [vmem:[%s2854_s11 + $0x190] sm:$0xff] }
  0x25   : > { %v298_v11 = vld [vmem:[%s2854_s11 + $0x198] sm:$0xff]  ;;  %v323_v12 = vpack.c.bf16 %v272_v8, %v271_v7  ;;  %v299_v13 = vld [vmem:[%s2854_s11 + $0x1a0] sm:$0xff]  ;;  %v300_v14 = vld [vmem:[%s2854_s11 + $0x1a8] sm:$0xff] }
  0x26   : > { %2398 = vmatmul.mubr.msk.bf16.gmra.mrb[4].mxu1 %vm344_vm1, %v330_v39  ;;  %v336_v15 = vpack.c.bf16 %v298_v11, %v297_v10  ;;  %v337_v16 = vpack.c.bf16 %v300_v14, %v299_v13  ;;  %v273_v17 = vld [vmem:[%s2854_s11 + $0xd0] sm:$0xff]  ;;  %v274_v18 = vld [vmem:[%s2854_s11 + $0xd8] sm:$0xff]  ;;  %v275_v19 = vld [vmem:[%s2854_s11 + $0xe0] sm:$0xff] }
  0x27   : > { %2401 = vmatprep.mubr.msk.bf16.mxu1 %vm344_vm1, %v331_v44  ;;  %2430 = vmatpush3.bf16.msra.mxu1 %v2679_v38  ;;  %v276_v20 = vld [vmem:[%s2854_s11 + $0xe8] sm:$0xff]  ;;  %v324_v21 = vpack.c.bf16 %v274_v18, %v273_v17  ;;  %v301_v22 = vld [vmem:[%s2854_s11 + $0x1b0] sm:$0xff]  ;;  %v302_v23 = vld [vmem:[%s2854_s11 + $0x1b8] sm:$0xff] }
  0x28   : > { %2431 = vmatprep.subr.bf16.mxu1 %v2680_v40  ;;  %v325_v24 = vpack.c.bf16 %v276_v20, %v275_v19  ;;  %v303_v25 = vld [vmem:[%s2854_s11 + $0x1c0] sm:$0xff]  ;;  %v304_v26 = vld [vmem:[%s2854_s11 + $0x1c8] sm:$0xff]  ;;  %v338_v27 = vpack.c.bf16 %v302_v23, %v301_v22  ;;  %v277_v29 = vld [vmem:[%s2854_s11 + $0xf0] sm:$0xff] }
  0x29   : > { %v339_v28 = vpack.c.bf16 %v304_v26, %v303_v25  ;;  %v278_v30 = vld [vmem:[%s2854_s11 + $0xf8] sm:$0xff]  ;;  %v307_v34 = vld [vmem:[%s2854_s11 + $0x1e0] sm:$0xff]  ;;  %v309_v38 = vld [vmem:[%s2854_s11 + $0x1f0] sm:$0xff] }
  0x2a   : > { %2370 = vmatmul.mubr.msk.bf16.gmra.mrb[8].mxu0 %vm344_vm1, %v316_v32  ;;  %v326_v31 = vpack.c.bf16 %v278_v30, %v277_v29  ;;  %v305_v32 = vld [vmem:[%s2854_s11 + $0x1d0] sm:$0xff]  ;;  %v306_v33 = vld [vmem:[%s2854_s11 + $0x1d8] sm:$0xff]  ;;  %v2685_v44 = vld [vmem:[%s3436_s3] sm:$0xff]  }
  0x2b   : > { %2373 = vmatprep.mubr.msk.bf16.mxu0 %vm344_vm1, %v317_v35  ;;  %2432 = vmatpush3.bf16.msra.mxu1 %v2680_v40  ;;  %v308_v35 = vld [vmem:[%s2854_s11 + $0x1e8] sm:$0xff]  ;;  %v340_v36 = vpack.c.bf16 %v306_v33, %v305_v32  ;;  %v310_v39 = vld [vmem:[%s2854_s11 + $0x1f8] sm:$0xff]  ;;  %v2689_v6 = vld [vmem:[%s3436_s3 + $0x20] sm:$0xff]  }
  0x2c   : > { %2433 = vmatprep.subr.bf16.mxu1 %v2681_v50  ;;  %v341_v37 = vpack.c.bf16 %v308_v35, %v307_v34  ;;  %v342_v40 = vpack.c.bf16 %v310_v39, %v309_v38  ;;  %v2684_v41 = vld [vmem:[%s3435_s2 + $0x38] sm:$0xff]   ;;  %v2686_v45 = vld [vmem:[%s3436_s3 + $0x8] sm:$0xff]   ;;  %2505 = vmatprep.subr.bf16.mxu0 %v2685_v44 }
  0x2d   : > { %2506 = vmatpush3.bf16.msra.mxu0 %v2685_v44 }
  0x2e   : > { %2402 = vmatmul.mubr.msk.bf16.gmra.mrb[8].mxu1 %vm344_vm1, %v332_v53  ;;  %2507 = vmatprep.subr.bf16.mxu0 %v2686_v45  ;;  %v2687_v53 = vld [vmem:[%s3436_s3 + $0x10] sm:$0xff]  }
  0x2f   : > { %2405 = vmatprep.mubr.msk.bf16.mxu1 %vm344_vm1, %v333_v54  ;;  %2434 = vmatpush3.bf16.msra.mxu1 %v2681_v50 }
  0x30   : > { %2435 = vmatprep.subr.bf16.mxu1 %v2682_v57 }
  0x31   : > { %2508 = vmatpush3.bf16.msra.mxu0 %v2686_v45 }
  0x32   : > { %2374 = vmatmul.mubr.msk.bf16.gmra.mrb[12].mxu0 %vm344_vm1, %v318_v51  ;;  %2509 = vmatprep.subr.bf16.mxu0 %v2687_v53 }
  0x33   : > { %2377 = vmatprep.mubr.msk.bf16.mxu0 %vm344_vm1, %v319_v52  ;;  %2436 = vmatpush3.bf16.msra.mxu1 %v2682_v57  ;;  %v2688_v57 = vld [vmem:[%s3436_s3 + $0x18] sm:$0xff]  }
  0x34   : > { %2437 = vmatprep.subr.bf16.mxu1 %v2683_v2 }
  0x35   : > { %2510 = vmatpush3.bf16.msra.mxu0 %v2687_v53 }
  0x36   : > { %2406 = vmatmul.mubr.msk.bf16.gmra.mrb[12].mxu1 %vm344_vm1, %v334_v3  ;;  %2511 = vmatprep.subr.bf16.mxu0 %v2688_v57 }
  0x37   : > { %2409 = vmatprep.mubr.msk.bf16.mxu1 %vm344_vm1, %v335_v4  ;;  %2438 = vmatpush3.bf16.msra.mxu1 %v2683_v2 }
  0x38   : > { %2439 = vmatprep.subr.bf16.mxu1 %v2684_v41 }
  0x39   : > { %2512 = vmatpush3.bf16.msra.mxu0 %v2688_v57 }
  0x3a   : > { %2378 = vmatmul.mubr.msk.bf16.gmra.mrb[16].mxu0 %vm344_vm1, %v320_v60  ;;  %2513 = vmatprep.subr.bf16.mxu0 %v2689_v6 }
  0x3b   : > { %2381 = vmatprep.mubr.msk.bf16.mxu0 %vm344_vm1, %v321_v63  ;;  %2440 = vmatpush3.bf16.msra.mxu1 %v2684_v41 }
  0x3d   : > { %2514 = vmatpush3.bf16.msra.mxu0 %v2689_v6 }
  0x3e   : > { %2410 = vmatmul.mubr.msk.bf16.gmra.mrb[16].mxu1 %vm344_vm1, %v336_v15  ;;  %v2690_v15 = vld [vmem:[%s3436_s3 + $0x28] sm:$0xff]  }
  0x3f   : > { %2413 = vmatprep.mubr.msk.bf16.mxu1 %vm344_vm1, %v337_v16  ;;  %2515 = vmatprep.subr.bf16.mxu0 %v2690_v15 }
  0x41   : > { %2516 = vmatpush3.bf16.msra.mxu0 %v2690_v15 }
  0x42   : > { %2382 = vmatmul.mubr.msk.bf16.gmra.mrb[20].mxu0 %vm344_vm1, %v322_v9 }
  0x43   : > { %2385 = vmatprep.mubr.msk.bf16.mxu0 %vm344_vm1, %v323_v12 }
  0x46   : > { %2414 = vmatmul.mubr.msk.bf16.gmra.mrb[20].mxu1 %vm344_vm1, %v338_v27 }
  0x47   : > { %2417 = vmatprep.mubr.msk.bf16.mxu1 %vm344_vm1, %v339_v28  ;;  %v2691_v28 = vld [vmem:[%s3436_s3 + $0x30] sm:$0xff]  }
  0x48   : > { %2517 = vmatprep.subr.bf16.mxu0 %v2691_v28 }
  0x49   : > { %2518 = vmatpush3.bf16.msra.mxu0 %v2691_v28 }
  0x4a   : > { %2386 = vmatmul.mubr.msk.bf16.gmra.mrb[24].mxu0 %vm344_vm1, %v324_v21 }
  0x4b   : > { %2389 = vmatprep.mubr.msk.bf16.mxu0 %vm344_vm1, %v325_v24 }
  0x4e   : > { %2418 = vmatmul.mubr.msk.bf16.gmra.mrb[24].mxu1 %vm344_vm1, %v340_v36 }
  0x4f   : > { %2421 = vmatprep.mubr.msk.bf16.mxu1 %vm344_vm1, %v341_v37 }
  0x52   : > { %2390 = vmatmul.mubr.msk.bf16.gmra.mrb[28].mxu0 %vm344_vm1, %v326_v31 }
  0x56   : > { %2422 = vmatmul.mubr.msk.bf16.gmra.mrb[28].mxu1 %vm344_vm1, %v342_v40 }
  0xed   : > { %v2363_v42 = vpop.f32.mrb[0].mxu0 }
  0xee   : > { %v479_v43 = vpop.f32.mrb[1].mxu0  ;;  %v736_v47 = vmax.f32 %v2363_v42, 0.0 }
  0xef   : > { %v2364_v46 = vpop.f32.mrb[2].mxu0  ;;  %v734_v50 = vmax.f32 %v479_v43, 0.0 }
  0xf0   : > { %v737_v48 = vmax.f32 %v2364_v46, 0.0  ;;  %v482_v49 = vpop.f32.mrb[3].mxu0 }
  0xf1   : > { %v735_v51 = vmax.f32 %v482_v49, 0.0  ;;  %v2395_v62 = vpop.f32.mrb[0].mxu1 }
  0xf2   : > { %v799_v52 = vpack.c.bf16 %v737_v48, %v736_v47  ;;  %v768_v1 = vmax.f32 %v2395_v62, 0.0  ;;  %v607_v2 = vpop.f32.mrb[1].mxu1 }
  0xf3   : > { %v798_v54 = vpack.c.bf16 %v735_v51, %v734_v50  ;;  %v766_v4 = vmax.f32 %v607_v2, 0.0  ;;  %v2396_v5 = vpop.f32.mrb[2].mxu1 }
  0xf4   : > { %v769_v8 = vmax.f32 %v2396_v5, 0.0  ;;  %v610_v9 = vpop.f32.mrb[3].mxu1 }
  0xf5   : > { %v2367_v55 = vpop.f32.mrb[4].mxu0  ;;  %2441 = vmatprep.mubr.bf16.mxu1 %v798_v54  ;;  %v767_v10 = vmax.f32 %v610_v9, 0.0 }
  0xf6   : > { %v495_v56 = vpop.f32.mrb[5].mxu0  ;;  %2442 = vmatmul.mubr.bf16.vlgmr.msra.gmra.mrb[32].mxu1 %v799_v52  ;;  %v740_v59 = vmax.f32 %v2367_v55, 0.0  ;;  %v2988_v12 = vpack.c.bf16 %v769_v8, %v768_v1 }
  0xf7   : > { %v2368_v58 = vpop.f32.mrb[6].mxu0  ;;  %v738_v63 = vmax.f32 %v495_v56, 0.0  ;;  %v2990_v14 = vpack.c.bf16 %v767_v10, %v766_v4 }
  0xf8   : > { %v741_v60 = vmax.f32 %v2368_v58, 0.0  ;;  %v498_v61 = vpop.f32.mrb[7].mxu0 }
  0xf9   : > { %v739_v0 = vmax.f32 %v498_v61, 0.0  ;;  %v2399_v20 = vpop.f32.mrb[4].mxu1 }
  0xfa   : > { %v801_v3 = vpack.c.bf16 %v741_v60, %v740_v59  ;;  %v772_v23 = vmax.f32 %v2399_v20, 0.0  ;;  %v623_v24 = vpop.f32.mrb[5].mxu1 }
  0xfb   : > { %v800_v7 = vpack.c.bf16 %v739_v0, %v738_v63  ;;  %v770_v26 = vmax.f32 %v623_v24, 0.0  ;;  %v2400_v27 = vpop.f32.mrb[6].mxu1 }
  0xfc   : > { %v773_v30 = vmax.f32 %v2400_v27, 0.0  ;;  %v626_v31 = vpop.f32.mrb[7].mxu1 }
  0xfd   : > { %v2371_v11 = vpop.f32.mrb[8].mxu0  ;;  %2445 = vmatprep.mubr.bf16.mxu1 %v800_v7  ;;  %v771_v32 = vmax.f32 %v626_v31, 0.0 }
  0xfe   : > { %v511_v13 = vpop.f32.mrb[9].mxu0  ;;  %2446 = vmatmul.mubr.bf16.gmra.mrb[36].mxu1 %v801_v3  ;;  %v744_v17 = vmax.f32 %v2371_v11, 0.0  ;;  %v2998_v34 = vpack.c.bf16 %v773_v30, %v772_v23 }
  0xff   : > { %v2372_v16 = vpop.f32.mrb[10].mxu0  ;;  %v742_v21 = vmax.f32 %v511_v13, 0.0  ;;  %v3000_v36 = vpack.c.bf16 %v771_v32, %v770_v26 }
 0x100   : > { %v745_v18 = vmax.f32 %v2372_v16, 0.0  ;;  %v514_v19 = vpop.f32.mrb[11].mxu0 }
 0x101   : > { %v743_v22 = vmax.f32 %v514_v19, 0.0  ;;  %v2403_v41 = vpop.f32.mrb[8].mxu1 }
 0x102   : > { %v803_v25 = vpack.c.bf16 %v745_v18, %v744_v17  ;;  %v776_v44 = vmax.f32 %v2403_v41, 0.0  ;;  %v639_v45 = vpop.f32.mrb[9].mxu1 }
 0x103   : > { %v802_v29 = vpack.c.bf16 %v743_v22, %v742_v21  ;;  %v774_v47 = vmax.f32 %v639_v45, 0.0  ;;  %v2404_v48 = vpop.f32.mrb[10].mxu1 }
 0x104   : > { %v777_v50 = vmax.f32 %v2404_v48, 0.0  ;;  %v642_v51 = vpop.f32.mrb[11].mxu1 }
 0x105   : > { %v2375_v33 = vpop.f32.mrb[12].mxu0  ;;  %2449 = vmatprep.mubr.bf16.mxu1 %v802_v29  ;;  %v775_v52 = vmax.f32 %v642_v51, 0.0 }
 0x106   : > { %v527_v35 = vpop.f32.mrb[13].mxu0  ;;  %2450 = vmatmul.mubr.bf16.gmra.mrb[40].mxu1 %v803_v25  ;;  %v748_v38 = vmax.f32 %v2375_v33, 0.0  ;;  %v3002_v54 = vpack.c.bf16 %v777_v50, %v776_v44 }
 0x107   : > { %v2376_v37 = vpop.f32.mrb[14].mxu0  ;;  %v746_v42 = vmax.f32 %v527_v35, 0.0  ;;  %v3004_v56 = vpack.c.bf16 %v775_v52, %v774_v47 }
 0x108   : > { %v749_v39 = vmax.f32 %v2376_v37, 0.0  ;;  %v530_v40 = vpop.f32.mrb[15].mxu0 }
 0x109   : > { %v747_v43 = vmax.f32 %v530_v40, 0.0  ;;  %v2407_v61 = vpop.f32.mrb[12].mxu1 }
 0x10a   : > { %v805_v46 = vpack.c.bf16 %v749_v39, %v748_v38  ;;  %v780_v0 = vmax.f32 %v2407_v61, 0.0  ;;  %v655_v1 = vpop.f32.mrb[13].mxu1 }
 0x10b   : > { %v804_v49 = vpack.c.bf16 %v747_v43, %v746_v42  ;;  %v778_v3 = vmax.f32 %v655_v1, 0.0  ;;  %v2408_v4 = vpop.f32.mrb[14].mxu1 }
 0x10c   : > { %v781_v6 = vmax.f32 %v2408_v4, 0.0  ;;  %v658_v7 = vpop.f32.mrb[15].mxu1 }
 0x10d   : > { %v2379_v53 = vpop.f32.mrb[16].mxu0  ;;  %2453 = vmatprep.mubr.bf16.mxu1 %v804_v49  ;;  %v779_v8 = vmax.f32 %v658_v7, 0.0 }
 0x10e   : > { %v543_v55 = vpop.f32.mrb[17].mxu0  ;;  %2454 = vmatmul.mubr.bf16.gmra.mrb[44].mxu1 %v805_v46  ;;  %v752_v58 = vmax.f32 %v2379_v53, 0.0  ;;  %v3006_v10 = vpack.c.bf16 %v781_v6, %v780_v0 }
 0x10f   : > { %v2380_v57 = vpop.f32.mrb[18].mxu0  ;;  %v750_v62 = vmax.f32 %v543_v55, 0.0  ;;  %v3008_v13 = vpack.c.bf16 %v779_v8, %v778_v3 }
 0x110   : > { %v753_v59 = vmax.f32 %v2380_v57, 0.0  ;;  %v546_v60 = vpop.f32.mrb[19].mxu0 }
 0x111   : > { %v751_v63 = vmax.f32 %v546_v60, 0.0  ;;  %v2411_v19 = vpop.f32.mrb[16].mxu1 }
 0x112   : > { %v807_v2 = vpack.c.bf16 %v753_v59, %v752_v58  ;;  %v784_v22 = vmax.f32 %v2411_v19, 0.0  ;;  %v671_v23 = vpop.f32.mrb[17].mxu1 }
 0x113   : > { %v806_v5 = vpack.c.bf16 %v751_v63, %v750_v62  ;;  %v782_v25 = vmax.f32 %v671_v23, 0.0  ;;  %v2412_v26 = vpop.f32.mrb[18].mxu1 }
 0x114   : > { %v785_v28 = vmax.f32 %v2412_v26, 0.0  ;;  %v674_v29 = vpop.f32.mrb[19].mxu1 }
 0x115   : > { %v2383_v9 = vpop.f32.mrb[20].mxu0  ;;  %2457 = vmatprep.mubr.bf16.mxu1 %v806_v5  ;;  %v783_v30 = vmax.f32 %v674_v29, 0.0 }
 0x116   : > { %v559_v11 = vpop.f32.mrb[21].mxu0  ;;  %2458 = vmatmul.mubr.bf16.gmra.mrb[48].mxu1 %v807_v2  ;;  %v756_v16 = vmax.f32 %v2383_v9, 0.0  ;;  %v3010_v32 = vpack.c.bf16 %v785_v28, %v784_v22 }
 0x117   : > { %v2384_v15 = vpop.f32.mrb[22].mxu0  ;;  %v754_v20 = vmax.f32 %v559_v11, 0.0  ;;  %v3012_v35 = vpack.c.bf16 %v783_v30, %v782_v25 }
 0x118   : > { %v757_v17 = vmax.f32 %v2384_v15, 0.0  ;;  %v562_v18 = vpop.f32.mrb[23].mxu0 }
 0x119   : > { %v755_v21 = vmax.f32 %v562_v18, 0.0  ;;  %v2415_v41 = vpop.f32.mrb[20].mxu1 }
 0x11a   : > { %v809_v24 = vpack.c.bf16 %v757_v17, %v756_v16  ;;  %v788_v44 = vmax.f32 %v2415_v41, 0.0  ;;  %v687_v45 = vpop.f32.mrb[21].mxu1 }
 0x11b   : > { %v808_v27 = vpack.c.bf16 %v755_v21, %v754_v20  ;;  %v786_v47 = vmax.f32 %v687_v45, 0.0  ;;  %v2416_v48 = vpop.f32.mrb[22].mxu1 }
 0x11c   : > { %v789_v50 = vmax.f32 %v2416_v48, 0.0  ;;  %v690_v51 = vpop.f32.mrb[23].mxu1 }
 0x11d   : > { %v2387_v31 = vpop.f32.mrb[24].mxu0  ;;  %2461 = vmatprep.mubr.bf16.mxu1 %v808_v27  ;;  %v787_v52 = vmax.f32 %v690_v51, 0.0 }
 0x11e   : > { %v575_v33 = vpop.f32.mrb[25].mxu0  ;;  %2462 = vmatmul.mubr.bf16.gmra.mrb[52].mxu1 %v809_v24  ;;  %v760_v38 = vmax.f32 %v2387_v31, 0.0  ;;  %v825_v55 = vpack.c.bf16 %v789_v50, %v788_v44 }
 0x11f   : > { %v2388_v37 = vpop.f32.mrb[26].mxu0  ;;  %v758_v42 = vmax.f32 %v575_v33, 0.0  ;;  %v824_v58 = vpack.c.bf16 %v787_v52, %v786_v47 }
 0x120   : > { %v761_v39 = vmax.f32 %v2388_v37, 0.0  ;;  %v578_v40 = vpop.f32.mrb[27].mxu0 }
 0x121   : > { %v759_v43 = vmax.f32 %v578_v40, 0.0  ;;  %v2419_v63 = vpop.f32.mrb[24].mxu1 }
 0x122   : > { %v811_v46 = vpack.c.bf16 %v761_v39, %v760_v38  ;;  %v792_v2 = vmax.f32 %v2419_v63, 0.0  ;;  %v703_v3 = vpop.f32.mrb[25].mxu1 }
 0x123   : > { %v810_v49 = vpack.c.bf16 %v759_v43, %v758_v42  ;;  %v790_v5 = vmax.f32 %v703_v3, 0.0  ;;  %v2420_v6 = vpop.f32.mrb[26].mxu1 }
 0x124   : > { %v793_v8 = vmax.f32 %v2420_v6, 0.0  ;;  %v706_v9 = vpop.f32.mrb[27].mxu1 }
 0x125   : > { %v2391_v53 = vpop.f32.mrb[28].mxu0  ;;  %2465 = vmatprep.mubr.bf16.mxu1 %v810_v49  ;;  %v791_v11 = vmax.f32 %v706_v9, 0.0 }
 0x126   : > { %v591_v57 = vpop.f32.mrb[29].mxu0  ;;  %2466 = vmatmul.mubr.bf16.gmra.mrb[56].mxu1 %v811_v46  ;;  %v764_v60 = vmax.f32 %v2391_v53, 0.0  ;;  %v827_v15 = vpack.c.bf16 %v793_v8, %v792_v2 }
 0x127   : > { %v2392_v59 = vpop.f32.mrb[30].mxu0  ;;  %v762_v0 = vmax.f32 %v591_v57, 0.0  ;;  %v826_v16 = vpack.c.bf16 %v791_v11, %v790_v5 }
 0x128   : > { %v765_v61 = vmax.f32 %v2392_v59, 0.0  ;;  %v594_v62 = vpop.f32.mrb[31].mxu0 }
 0x129   : > { %v763_v1 = vmax.f32 %v594_v62, 0.0  ;;  %v2423_v17 = vpop.f32.mrb[28].mxu1 }
 0x12a   : > { %v813_v4 = vpack.c.bf16 %v765_v61, %v764_v60  ;;  %v796_v18 = vmax.f32 %v2423_v17, 0.0  ;;  %v719_v19 = vpop.f32.mrb[29].mxu1 }
 0x12b   : > { %v812_v7 = vpack.c.bf16 %v763_v1, %v762_v0  ;;  %v794_v20 = vmax.f32 %v719_v19, 0.0  ;;  %v2424_v21 = vpop.f32.mrb[30].mxu1 }
 0x12c   : > { %v797_v22 = vmax.f32 %v2424_v21, 0.0  ;;  %v722_v23 = vpop.f32.mrb[31].mxu1 }
 0x12d   : > { %2469 = vmatprep.mubr.bf16.mxu1 %v812_v7  ;;  %v795_v24 = vmax.f32 %v722_v23, 0.0 }
 0x12e   : > { %2470 = vmatmul.mubr.bf16.gmra.mrb[60].mxu1 %v813_v4  ;;  %v829_v25 = vpack.c.bf16 %v797_v22, %v796_v18 }
 0x12f   : > { %2473 = vmatprep.mubr.bf16.mxu1 %v2990_v14  ;;  %v828_v26 = vpack.c.bf16 %v795_v24, %v794_v20  ;;  %v2692_v14 = vld [vmem:[%s3436_s3 + $0x38] sm:$0xff]  }
 0x130   : > { %2519 = vmatprep.subr.bf16.mxu0 %v2692_v14 }
 0x131   : > { %2520 = vmatpush3.bf16.msra.mxu0 %v2692_v14 }
 0x136   : > { %2474 = vmatmul.mubr.bf16.gmra.mrb[64].mxu1 %v2988_v12 }
 0x137   : > { %2477 = vmatprep.mubr.bf16.mxu1 %v3000_v36 }
 0x13e   : > { %2478 = vmatmul.mubr.bf16.gmra.mrb[68].mxu1 %v2998_v34 }
 0x13f   : > { %2481 = vmatprep.mubr.bf16.mxu1 %v3004_v56 }
 0x146   : > { %2482 = vmatmul.mubr.bf16.gmra.mrb[72].mxu1 %v3002_v54 }
 0x147   : > { %2485 = vmatprep.mubr.bf16.mxu1 %v3008_v13 }
 0x14e   : > { %2486 = vmatmul.mubr.bf16.gmra.mrb[76].mxu1 %v3006_v10 }
 0x14f   : > { %2489 = vmatprep.mubr.bf16.mxu1 %v3012_v35 }
 0x156   : > { %2490 = vmatmul.mubr.bf16.gmra.mrb[80].mxu1 %v3010_v32 }
 0x157   : > { %2493 = vmatprep.mubr.bf16.mxu1 %v824_v58 }
 0x15e   : > { %2494 = vmatmul.mubr.bf16.gmra.mrb[84].mxu1 %v825_v55 }
 0x15f   : > { %2497 = vmatprep.mubr.bf16.mxu1 %v826_v16 }
 0x166   : > { %2498 = vmatmul.mubr.bf16.gmra.mrb[88].mxu1 %v827_v15 }
 0x167   : > { %2501 = vmatprep.mubr.bf16.mxu1 %v828_v26 }
 0x16e   : > { %2502 = vmatmul.mubr.bf16.gmra.mrb[92].mxu1 %v829_v25 }
 0x1c9   : > { %v2443_v12 = vpop.f32.mrb[32].mxu1 }
 0x1ca   : > { %v928_v34 = vpop.f32.mrb[33].mxu1  ;;  %v1185_v54 = vmax.f32 %v2443_v12, 0.0 }
 0x1cb   : > { %v2444_v36 = vpop.f32.mrb[34].mxu1  ;;  %v1183_v27 = vmax.f32 %v928_v34, 0.0 }
 0x1cc   : > { %v1186_v56 = vmax.f32 %v2444_v36, 0.0  ;;  %v931_v13 = vpop.f32.mrb[35].mxu1 }
 0x1cd   : > { %v1184_v28 = vmax.f32 %v931_v13, 0.0 }
 0x1ce   : > { %v1248_v29 = vpack.c.bf16 %v1186_v56, %v1185_v54 }
 0x1cf   : > { %v1247_v10 = vpack.c.bf16 %v1184_v28, %v1183_v27 }
 0x1d1   : > { %v2447_v30 = vpop.f32.mrb[36].mxu1  ;;  %2521 = vmatprep.mubr.bf16.mxu0 %v1247_v10 }
 0x1d2   : > { %v944_v31 = vpop.f32.mrb[37].mxu1  ;;  %2522 = vmatmul.mubr.bf16.vlgmr.msra.gmra.mrb[32].mxu0 %v1248_v29  ;;  %v1189_v33 = vmax.f32 %v2447_v30, 0.0 }
 0x1d3   : > { %v2448_v32 = vpop.f32.mrb[38].mxu1  ;;  %v1187_v38 = vmax.f32 %v944_v31, 0.0 }
 0x1d4   : > { %v1190_v35 = vmax.f32 %v2448_v32, 0.0  ;;  %v947_v37 = vpop.f32.mrb[39].mxu1 }
 0x1d5   : > { %v1188_v39 = vmax.f32 %v947_v37, 0.0 }
 0x1d6   : > { %v1250_v40 = vpack.c.bf16 %v1190_v35, %v1189_v33 }
 0x1d7   : > { %v1249_v41 = vpack.c.bf16 %v1188_v39, %v1187_v38 }
 0x1d9   : > { %v2451_v42 = vpop.f32.mrb[40].mxu1  ;;  %2525 = vmatprep.mubr.bf16.mxu0 %v1249_v41 }
 0x1da   : > { %v960_v43 = vpop.f32.mrb[41].mxu1  ;;  %2526 = vmatmul.mubr.bf16.gmra.mrb[36].mxu0 %v1250_v40  ;;  %v1193_v45 = vmax.f32 %v2451_v42, 0.0 }
 0x1db   : > { %v2452_v44 = vpop.f32.mrb[42].mxu1  ;;  %v1191_v48 = vmax.f32 %v960_v43, 0.0 }
 0x1dc   : > { %v1194_v46 = vmax.f32 %v2452_v44, 0.0  ;;  %v963_v47 = vpop.f32.mrb[43].mxu1 }
 0x1dd   : > { %v1192_v49 = vmax.f32 %v963_v47, 0.0 }
 0x1de   : > { %v1252_v50 = vpack.c.bf16 %v1194_v46, %v1193_v45 }
 0x1df   : > { %v1251_v51 = vpack.c.bf16 %v1192_v49, %v1191_v48 }
 0x1e1   : > { %v2455_v52 = vpop.f32.mrb[44].mxu1  ;;  %2529 = vmatprep.mubr.bf16.mxu0 %v1251_v51 }
 0x1e2   : > { %v976_v53 = vpop.f32.mrb[45].mxu1  ;;  %2530 = vmatmul.mubr.bf16.gmra.mrb[40].mxu0 %v1252_v50  ;;  %v1197_v57 = vmax.f32 %v2455_v52, 0.0 }
 0x1e3   : > { %v2456_v55 = vpop.f32.mrb[46].mxu1  ;;  %v1195_v60 = vmax.f32 %v976_v53, 0.0 }
 0x1e4   : > { %v1198_v58 = vmax.f32 %v2456_v55, 0.0  ;;  %v979_v59 = vpop.f32.mrb[47].mxu1 }
 0x1e5   : > { %v1196_v61 = vmax.f32 %v979_v59, 0.0 }
 0x1e6   : > { %v1254_v62 = vpack.c.bf16 %v1198_v58, %v1197_v57 }
 0x1e7   : > { %v1253_v63 = vpack.c.bf16 %v1196_v61, %v1195_v60 }
 0x1e9   : > { %v2459_v0 = vpop.f32.mrb[48].mxu1  ;;  %2533 = vmatprep.mubr.bf16.mxu0 %v1253_v63 }
 0x1ea   : > { %v992_v1 = vpop.f32.mrb[49].mxu1  ;;  %2534 = vmatmul.mubr.bf16.gmra.mrb[44].mxu0 %v1254_v62  ;;  %v1201_v3 = vmax.f32 %v2459_v0, 0.0 }
 0x1eb   : > { %v2460_v2 = vpop.f32.mrb[50].mxu1  ;;  %v1199_v6 = vmax.f32 %v992_v1, 0.0 }
 0x1ec   : > { %v1202_v4 = vmax.f32 %v2460_v2, 0.0  ;;  %v995_v5 = vpop.f32.mrb[51].mxu1 }
 0x1ed   : > { %v1200_v7 = vmax.f32 %v995_v5, 0.0 }
 0x1ee   : > { %v1256_v8 = vpack.c.bf16 %v1202_v4, %v1201_v3 }
 0x1ef   : > { %v1255_v9 = vpack.c.bf16 %v1200_v7, %v1199_v6 }
 0x1f1   : > { %v2463_v11 = vpop.f32.mrb[52].mxu1  ;;  %2537 = vmatprep.mubr.bf16.mxu0 %v1255_v9 }
 0x1f2   : > { %v1008_v15 = vpop.f32.mrb[53].mxu1  ;;  %2538 = vmatmul.mubr.bf16.gmra.mrb[48].mxu0 %v1256_v8  ;;  %v1205_v17 = vmax.f32 %v2463_v11, 0.0 }
 0x1f3   : > { %v2464_v16 = vpop.f32.mrb[54].mxu1  ;;  %v1203_v20 = vmax.f32 %v1008_v15, 0.0 }
 0x1f4   : > { %v1206_v18 = vmax.f32 %v2464_v16, 0.0  ;;  %v1011_v19 = vpop.f32.mrb[55].mxu1 }
 0x1f5   : > { %v1204_v21 = vmax.f32 %v1011_v19, 0.0 }
 0x1f6   : > { %v1258_v22 = vpack.c.bf16 %v1206_v18, %v1205_v17 }
 0x1f7   : > { %v1257_v23 = vpack.c.bf16 %v1204_v21, %v1203_v20 }
 0x1f9   : > { %v2467_v24 = vpop.f32.mrb[56].mxu1  ;;  %2541 = vmatprep.mubr.bf16.mxu0 %v1257_v23 }
 0x1fa   : > { %v1024_v25 = vpop.f32.mrb[57].mxu1  ;;  %2542 = vmatmul.mubr.bf16.gmra.mrb[52].mxu0 %v1258_v22  ;;  %v1209_v14 = vmax.f32 %v2467_v24, 0.0 }
 0x1fb   : > { %v2468_v26 = vpop.f32.mrb[58].mxu1  ;;  %v1207_v36 = vmax.f32 %v1024_v25, 0.0 }
 0x1fc   : > { %v1210_v12 = vmax.f32 %v2468_v26, 0.0  ;;  %v1027_v34 = vpop.f32.mrb[59].mxu1 }
 0x1fd   : > { %v1208_v54 = vmax.f32 %v1027_v34, 0.0 }
 0x1fe   : > { %v1260_v56 = vpack.c.bf16 %v1210_v12, %v1209_v14 }
 0x1ff   : > { %v1259_v13 = vpack.c.bf16 %v1208_v54, %v1207_v36 }
 0x201   : > { %v2471_v27 = vpop.f32.mrb[60].mxu1  ;;  %2545 = vmatprep.mubr.bf16.mxu0 %v1259_v13 }
 0x202   : > { %v1040_v28 = vpop.f32.mrb[61].mxu1  ;;  %2546 = vmatmul.mubr.bf16.gmra.mrb[56].mxu0 %v1260_v56  ;;  %v1213_v10 = vmax.f32 %v2471_v27, 0.0 }
 0x203   : > { %v2472_v29 = vpop.f32.mrb[62].mxu1  ;;  %v1211_v32 = vmax.f32 %v1040_v28, 0.0 }
 0x204   : > { %v1214_v30 = vmax.f32 %v2472_v29, 0.0  ;;  %v1043_v31 = vpop.f32.mrb[63].mxu1 }
 0x205   : > { %v1212_v33 = vmax.f32 %v1043_v31, 0.0 }
 0x206   : > { %v1262_v35 = vpack.c.bf16 %v1214_v30, %v1213_v10 }
 0x207   : > { %v1261_v37 = vpack.c.bf16 %v1212_v33, %v1211_v32 }
 0x209   : > { %v2475_v38 = vpop.f32.mrb[64].mxu1  ;;  %2549 = vmatprep.mubr.bf16.mxu0 %v1261_v37 }
 0x20a   : > { %v1056_v39 = vpop.f32.mrb[65].mxu1  ;;  %2550 = vmatmul.mubr.bf16.gmra.mrb[60].mxu0 %v1262_v35  ;;  %v1217_v41 = vmax.f32 %v2475_v38, 0.0 }
 0x20b   : > { %v2476_v40 = vpop.f32.mrb[66].mxu1  ;;  %v1215_v44 = vmax.f32 %v1056_v39, 0.0 }
 0x20c   : > { %v1218_v42 = vmax.f32 %v2476_v40, 0.0  ;;  %v1059_v43 = vpop.f32.mrb[67].mxu1 }
 0x20d   : > { %v1216_v45 = vmax.f32 %v1059_v43, 0.0 }
 0x20e   : > { %v1264_v46 = vpack.c.bf16 %v1218_v42, %v1217_v41 }
 0x20f   : > { %v1263_v47 = vpack.c.bf16 %v1216_v45, %v1215_v44 }
 0x211   : > { %v2479_v48 = vpop.f32.mrb[68].mxu1  ;;  %2553 = vmatprep.mubr.bf16.mxu0 %v1263_v47 }
 0x212   : > { %v1072_v49 = vpop.f32.mrb[69].mxu1  ;;  %2554 = vmatmul.mubr.bf16.gmra.mrb[64].mxu0 %v1264_v46  ;;  %v1221_v51 = vmax.f32 %v2479_v48, 0.0 }
 0x213   : > { %v2480_v50 = vpop.f32.mrb[70].mxu1  ;;  %v1219_v55 = vmax.f32 %v1072_v49, 0.0 }
 0x214   : > { %v1222_v52 = vmax.f32 %v2480_v50, 0.0  ;;  %v1075_v53 = vpop.f32.mrb[71].mxu1 }
 0x215   : > { %v1220_v57 = vmax.f32 %v1075_v53, 0.0 }
 0x216   : > { %v1266_v58 = vpack.c.bf16 %v1222_v52, %v1221_v51 }
 0x217   : > { %v1265_v59 = vpack.c.bf16 %v1220_v57, %v1219_v55  ;;  %v3031_v55 = vld [vmem:[%s3437_s4] ss:$0 sm:$0xff] }
 0x219   : > { %v2483_v60 = vpop.f32.mrb[72].mxu1  ;;  %2557 = vmatprep.mubr.bf16.mxu0 %v1265_v59 }
 0x21a   : > { %v1088_v61 = vpop.f32.mrb[73].mxu1  ;;  %2558 = vmatmul.mubr.bf16.gmra.mrb[68].mxu0 %v1266_v58  ;;  %v1225_v63 = vmax.f32 %v2483_v60, 0.0 }
 0x21b   : > { %v2484_v62 = vpop.f32.mrb[74].mxu1  ;;  %v1223_v2 = vmax.f32 %v1088_v61, 0.0 }
 0x21c   : > { %v1226_v0 = vmax.f32 %v2484_v62, 0.0  ;;  %v1091_v1 = vpop.f32.mrb[75].mxu1 }
 0x21d   : > { %v1224_v3 = vmax.f32 %v1091_v1, 0.0 }
 0x21e   : > { %v1268_v4 = vpack.c.bf16 %v1226_v0, %v1225_v63 }
 0x21f   : > { %v1267_v5 = vpack.c.bf16 %v1224_v3, %v1223_v2 }
 0x221   : > { %v2487_v6 = vpop.f32.mrb[76].mxu1  ;;  %2561 = vmatprep.mubr.bf16.mxu0 %v1267_v5 }
 0x222   : > { %v1104_v7 = vpop.f32.mrb[77].mxu1  ;;  %2562 = vmatmul.mubr.bf16.gmra.mrb[72].mxu0 %v1268_v4  ;;  %v1229_v9 = vmax.f32 %v2487_v6, 0.0 }
 0x223   : > { %v2488_v8 = vpop.f32.mrb[78].mxu1  ;;  %v1227_v16 = vmax.f32 %v1104_v7, 0.0 }
 0x224   : > { %v1230_v11 = vmax.f32 %v2488_v8, 0.0  ;;  %v1107_v15 = vpop.f32.mrb[79].mxu1 }
 0x225   : > { %v1228_v17 = vmax.f32 %v1107_v15, 0.0 }
 0x226   : > { %v1270_v18 = vpack.c.bf16 %v1230_v11, %v1229_v9 }
 0x227   : > { %v1269_v19 = vpack.c.bf16 %v1228_v17, %v1227_v16 }
 0x229   : > { %v2491_v20 = vpop.f32.mrb[80].mxu1  ;;  %2565 = vmatprep.mubr.bf16.mxu0 %v1269_v19 }
 0x22a   : > { %v1120_v21 = vpop.f32.mrb[81].mxu1  ;;  %2566 = vmatmul.mubr.bf16.gmra.mrb[76].mxu0 %v1270_v18  ;;  %v1233_v23 = vmax.f32 %v2491_v20, 0.0 }
 0x22b   : > { %v2492_v22 = vpop.f32.mrb[82].mxu1  ;;  %v1231_v26 = vmax.f32 %v1120_v21, 0.0 }
 0x22c   : > { %v1234_v24 = vmax.f32 %v2492_v22, 0.0  ;;  %v1123_v25 = vpop.f32.mrb[83].mxu1 }
 0x22d   : > { %v1232_v14 = vmax.f32 %v1123_v25, 0.0 }
 0x22e   : > { %v1272_v12 = vpack.c.bf16 %v1234_v24, %v1233_v23 }
 0x22f   : > { %v1271_v34 = vpack.c.bf16 %v1232_v14, %v1231_v26 }
 0x231   : > { %v2495_v36 = vpop.f32.mrb[84].mxu1  ;;  %2569 = vmatprep.mubr.bf16.mxu0 %v1271_v34 }
 0x232   : > { %v1136_v54 = vpop.f32.mrb[85].mxu1  ;;  %2570 = vmatmul.mubr.bf16.gmra.mrb[80].mxu0 %v1272_v12  ;;  %v1237_v13 = vmax.f32 %v2495_v36, 0.0 }
 0x233   : > { %v2496_v56 = vpop.f32.mrb[86].mxu1  ;;  %v1235_v29 = vmax.f32 %v1136_v54, 0.0 }
 0x234   : > { %v1238_v27 = vmax.f32 %v2496_v56, 0.0  ;;  %v1139_v28 = vpop.f32.mrb[87].mxu1 }
 0x235   : > { %v1236_v10 = vmax.f32 %v1139_v28, 0.0 }
 0x236   : > { %v1274_v30 = vpack.c.bf16 %v1238_v27, %v1237_v13 }
 0x237   : > { %v1273_v31 = vpack.c.bf16 %v1236_v10, %v1235_v29 }
 0x239   : > { %v2499_v32 = vpop.f32.mrb[88].mxu1  ;;  %2573 = vmatprep.mubr.bf16.mxu0 %v1273_v31 }
 0x23a   : > { %v1152_v33 = vpop.f32.mrb[89].mxu1  ;;  %2574 = vmatmul.mubr.bf16.gmra.mrb[84].mxu0 %v1274_v30  ;;  %v1241_v37 = vmax.f32 %v2499_v32, 0.0 }
 0x23b   : > { %v2500_v35 = vpop.f32.mrb[90].mxu1  ;;  %v1239_v40 = vmax.f32 %v1152_v33, 0.0 }
 0x23c   : > { %v1242_v38 = vmax.f32 %v2500_v35, 0.0  ;;  %v1155_v39 = vpop.f32.mrb[91].mxu1 }
 0x23d   : > { %v1240_v41 = vmax.f32 %v1155_v39, 0.0 }
 0x23e   : > { %v1276_v42 = vpack.c.bf16 %v1242_v38, %v1241_v37 }
 0x23f   : > { %v1275_v43 = vpack.c.bf16 %v1240_v41, %v1239_v40 }
 0x241   : > { %v2503_v44 = vpop.f32.mrb[92].mxu1  ;;  %2577 = vmatprep.mubr.bf16.mxu0 %v1275_v43 }
 0x242   : > { %v1168_v45 = vpop.f32.mrb[93].mxu1  ;;  %2578 = vmatmul.mubr.bf16.gmra.mrb[88].mxu0 %v1276_v42  ;;  %v1245_v47 = vmax.f32 %v2503_v44, 0.0 }
 0x243   : > { %v2504_v46 = vpop.f32.mrb[94].mxu1  ;;  %v1243_v50 = vmax.f32 %v1168_v45, 0.0 }
 0x244   : > { %v1246_v48 = vmax.f32 %v2504_v46, 0.0  ;;  %v1171_v49 = vpop.f32.mrb[95].mxu1 }
 0x245   : > { %v1244_v51 = vmax.f32 %v1171_v49, 0.0 }
 0x246   : > { %v1278_v52 = vpack.c.bf16 %v1246_v48, %v1245_v47 }
 0x247   : > { %v1277_v53 = vpack.c.bf16 %v1244_v51, %v1243_v50 }
 0x249   : > { %2581 = vmatprep.mubr.bf16.mxu0 %v1277_v53 }
 0x24a   : > { %2582 = vmatmul.mubr.bf16.gmra.mrb[92].mxu0 %v1278_v52 }
 0x2a5   : > { %v2523_v57 = vpop.f32.mrb[32].mxu0 }
 0x2a6   : > { %v1393_v58 = vadd.f32 %v2523_v57, %v3031_v55  ;;  %v1384_v59 = vpop.f32.mrb[33].mxu0 }
 0x2a7   : > { %v1385_v60 = vadd.f32 %v3031_v55, %v1384_v59  ;;  %v2524_v61 = vpop.f32.mrb[34].mxu0 }
 0x2a8   : > { %1641 = vst.msk [vmem:[%s3035_s10 + $0x10] sm:$0xff] %vm344_vm1, %v1393_v58  ;;  %v1396_v62 = vadd.f32 %v2524_v61, %v3031_v55  ;;  %v1387_v63 = vpop.f32.mrb[35].mxu0 }
 0x2a9   : > { %1639 = vst.msk [vmem:[%s3035_s10] sm:$0xff] %vm344_vm1, %v1385_v60  ;;  %v1388_v0 = vadd.f32 %v3031_v55, %v1387_v63 }
 0x2aa   : > { %1642 = vst.msk [vmem:[%s3035_s10 + $0x18] sm:$0xff] %vm344_vm1, %v1396_v62 }
 0x2ab   : > { %1640 = vst.msk [vmem:[%s3035_s10 + $0x8] sm:$0xff] %vm344_vm1, %v1388_v0 }
 0x2ad   : > { %v2527_v1 = vpop.f32.mrb[36].mxu0 }
 0x2ae   : > { %v1409_v2 = vadd.f32 %v2527_v1, %v3031_v55  ;;  %v1400_v3 = vpop.f32.mrb[37].mxu0 }
 0x2af   : > { %v1401_v4 = vadd.f32 %v3031_v55, %v1400_v3  ;;  %v2528_v5 = vpop.f32.mrb[38].mxu0 }
 0x2b0   : > { %1645 = vst.msk [vmem:[%s3035_s10 + $0x30] sm:$0xff] %vm344_vm1, %v1409_v2  ;;  %v1412_v6 = vadd.f32 %v2528_v5, %v3031_v55  ;;  %v1403_v7 = vpop.f32.mrb[39].mxu0 }
 0x2b1   : > { %1643 = vst.msk [vmem:[%s3035_s10 + $0x20] sm:$0xff] %vm344_vm1, %v1401_v4  ;;  %v1404_v8 = vadd.f32 %v3031_v55, %v1403_v7 }
 0x2b2   : > { %1646 = vst.msk [vmem:[%s3035_s10 + $0x38] sm:$0xff] %vm344_vm1, %v1412_v6 }
 0x2b3   : > { %1644 = vst.msk [vmem:[%s3035_s10 + $0x28] sm:$0xff] %vm344_vm1, %v1404_v8 }
 0x2b5   : > { %v2531_v9 = vpop.f32.mrb[40].mxu0 }
 0x2b6   : > { %v1425_v11 = vadd.f32 %v2531_v9, %v3031_v55  ;;  %v1416_v15 = vpop.f32.mrb[41].mxu0 }
 0x2b7   : > { %v1417_v16 = vadd.f32 %v3031_v55, %v1416_v15  ;;  %v2532_v17 = vpop.f32.mrb[42].mxu0 }
 0x2b8   : > { %1649 = vst.msk [vmem:[%s3035_s10 + $0x50] sm:$0xff] %vm344_vm1, %v1425_v11  ;;  %v1428_v18 = vadd.f32 %v2532_v17, %v3031_v55  ;;  %v1419_v19 = vpop.f32.mrb[43].mxu0 }
 0x2b9   : > { %1647 = vst.msk [vmem:[%s3035_s10 + $0x40] sm:$0xff] %vm344_vm1, %v1417_v16  ;;  %v1420_v20 = vadd.f32 %v3031_v55, %v1419_v19 }
 0x2ba   : > { %1650 = vst.msk [vmem:[%s3035_s10 + $0x58] sm:$0xff] %vm344_vm1, %v1428_v18 }
 0x2bb   : > { %1648 = vst.msk [vmem:[%s3035_s10 + $0x48] sm:$0xff] %vm344_vm1, %v1420_v20 }
 0x2bd   : > { %v2535_v21 = vpop.f32.mrb[44].mxu0 }
 0x2be   : > { %v1441_v22 = vadd.f32 %v2535_v21, %v3031_v55  ;;  %v1432_v23 = vpop.f32.mrb[45].mxu0 }
 0x2bf   : > { %v1433_v24 = vadd.f32 %v3031_v55, %v1432_v23  ;;  %v2536_v25 = vpop.f32.mrb[46].mxu0 }
 0x2c0   : > { %1653 = vst.msk [vmem:[%s3035_s10 + $0x70] sm:$0xff] %vm344_vm1, %v1441_v22  ;;  %v1444_v26 = vadd.f32 %v2536_v25, %v3031_v55  ;;  %v1435_v14 = vpop.f32.mrb[47].mxu0 }
 0x2c1   : > { %1651 = vst.msk [vmem:[%s3035_s10 + $0x60] sm:$0xff] %vm344_vm1, %v1433_v24  ;;  %v1436_v12 = vadd.f32 %v3031_v55, %v1435_v14 }
 0x2c2   : > { %1654 = vst.msk [vmem:[%s3035_s10 + $0x78] sm:$0xff] %vm344_vm1, %v1444_v26 }
 0x2c3   : > { %1652 = vst.msk [vmem:[%s3035_s10 + $0x68] sm:$0xff] %vm344_vm1, %v1436_v12 }
 0x2c5   : > { %v2539_v34 = vpop.f32.mrb[48].mxu0 }
 0x2c6   : > { %v1457_v36 = vadd.f32 %v2539_v34, %v3031_v55  ;;  %v1448_v54 = vpop.f32.mrb[49].mxu0 }
 0x2c7   : > { %v1449_v56 = vadd.f32 %v3031_v55, %v1448_v54  ;;  %v2540_v13 = vpop.f32.mrb[50].mxu0 }
 0x2c8   : > { %1657 = vst.msk [vmem:[%s3035_s10 + $0x90] sm:$0xff] %vm344_vm1, %v1457_v36  ;;  %v1460_v27 = vadd.f32 %v2540_v13, %v3031_v55  ;;  %v1451_v28 = vpop.f32.mrb[51].mxu0 }
 0x2c9   : > { %1655 = vst.msk [vmem:[%s3035_s10 + $0x80] sm:$0xff] %vm344_vm1, %v1449_v56  ;;  %v1452_v29 = vadd.f32 %v3031_v55, %v1451_v28 }
 0x2ca   : > { %1658 = vst.msk [vmem:[%s3035_s10 + $0x98] sm:$0xff] %vm344_vm1, %v1460_v27 }
 0x2cb   : > { %1656 = vst.msk [vmem:[%s3035_s10 + $0x88] sm:$0xff] %vm344_vm1, %v1452_v29 }
 0x2cd   : > { %v2543_v10 = vpop.f32.mrb[52].mxu0 }
 0x2ce   : > { %v1473_v30 = vadd.f32 %v2543_v10, %v3031_v55  ;;  %v1464_v31 = vpop.f32.mrb[53].mxu0 }
 0x2cf   : > { %v1465_v32 = vadd.f32 %v3031_v55, %v1464_v31  ;;  %v2544_v33 = vpop.f32.mrb[54].mxu0 }
 0x2d0   : > { %1661 = vst.msk [vmem:[%s3035_s10 + $0xb0] sm:$0xff] %vm344_vm1, %v1473_v30  ;;  %v1476_v35 = vadd.f32 %v2544_v33, %v3031_v55  ;;  %v1467_v37 = vpop.f32.mrb[55].mxu0 }
 0x2d1   : > { %1659 = vst.msk [vmem:[%s3035_s10 + $0xa0] sm:$0xff] %vm344_vm1, %v1465_v32  ;;  %v1468_v38 = vadd.f32 %v3031_v55, %v1467_v37 }
 0x2d2   : > { %1662 = vst.msk [vmem:[%s3035_s10 + $0xb8] sm:$0xff] %vm344_vm1, %v1476_v35 }
 0x2d3   : > { %1660 = vst.msk [vmem:[%s3035_s10 + $0xa8] sm:$0xff] %vm344_vm1, %v1468_v38 }
 0x2d5   : > { %v2547_v39 = vpop.f32.mrb[56].mxu0 }
 0x2d6   : > { %v1489_v40 = vadd.f32 %v2547_v39, %v3031_v55  ;;  %v1480_v41 = vpop.f32.mrb[57].mxu0 }
 0x2d7   : > { %v1481_v42 = vadd.f32 %v3031_v55, %v1480_v41  ;;  %v2548_v43 = vpop.f32.mrb[58].mxu0 }
 0x2d8   : > { %1665 = vst.msk [vmem:[%s3035_s10 + $0xd0] sm:$0xff] %vm344_vm1, %v1489_v40  ;;  %v1492_v44 = vadd.f32 %v2548_v43, %v3031_v55  ;;  %v1483_v45 = vpop.f32.mrb[59].mxu0 }
 0x2d9   : > { %1663 = vst.msk [vmem:[%s3035_s10 + $0xc0] sm:$0xff] %vm344_vm1, %v1481_v42  ;;  %v1484_v46 = vadd.f32 %v3031_v55, %v1483_v45 }
 0x2da   : > { %1666 = vst.msk [vmem:[%s3035_s10 + $0xd8] sm:$0xff] %vm344_vm1, %v1492_v44 }
 0x2db   : > { %1664 = vst.msk [vmem:[%s3035_s10 + $0xc8] sm:$0xff] %vm344_vm1, %v1484_v46 }
 0x2dd   : > { %v2551_v47 = vpop.f32.mrb[60].mxu0 }
 0x2de   : > { %v1505_v48 = vadd.f32 %v2551_v47, %v3031_v55  ;;  %v1496_v49 = vpop.f32.mrb[61].mxu0 }
 0x2df   : > { %v1497_v50 = vadd.f32 %v3031_v55, %v1496_v49  ;;  %v2552_v51 = vpop.f32.mrb[62].mxu0 }
 0x2e0   : > { %1669 = vst.msk [vmem:[%s3035_s10 + $0xf0] sm:$0xff] %vm344_vm1, %v1505_v48  ;;  %v1508_v52 = vadd.f32 %v2552_v51, %v3031_v55  ;;  %v1499_v53 = vpop.f32.mrb[63].mxu0 }
 0x2e1   : > { %1667 = vst.msk [vmem:[%s3035_s10 + $0xe0] sm:$0xff] %vm344_vm1, %v1497_v50  ;;  %v1500_v57 = vadd.f32 %v3031_v55, %v1499_v53 }
 0x2e2   : > { %1670 = vst.msk [vmem:[%s3035_s10 + $0xf8] sm:$0xff] %vm344_vm1, %v1508_v52 }
 0x2e3   : > { %1668 = vst.msk [vmem:[%s3035_s10 + $0xe8] sm:$0xff] %vm344_vm1, %v1500_v57 }
 0x2e5   : > { %v2555_v58 = vpop.f32.mrb[64].mxu0 }
 0x2e6   : > { %v1521_v59 = vadd.f32 %v2555_v58, %v3031_v55  ;;  %v1512_v60 = vpop.f32.mrb[65].mxu0 }
 0x2e7   : > { %v1513_v61 = vadd.f32 %v3031_v55, %v1512_v60  ;;  %v2556_v62 = vpop.f32.mrb[66].mxu0 }
 0x2e8   : > { %1673 = vst.msk [vmem:[%s3035_s10 + $0x110] sm:$0xff] %vm344_vm1, %v1521_v59  ;;  %v1524_v63 = vadd.f32 %v2556_v62, %v3031_v55  ;;  %v1515_v0 = vpop.f32.mrb[67].mxu0 }
 0x2e9   : > { %1671 = vst.msk [vmem:[%s3035_s10 + $0x100] sm:$0xff] %vm344_vm1, %v1513_v61  ;;  %v1516_v1 = vadd.f32 %v3031_v55, %v1515_v0 }
 0x2ea   : > { %1674 = vst.msk [vmem:[%s3035_s10 + $0x118] sm:$0xff] %vm344_vm1, %v1524_v63 }
 0x2eb   : > { %1672 = vst.msk [vmem:[%s3035_s10 + $0x108] sm:$0xff] %vm344_vm1, %v1516_v1 }
 0x2ed   : > { %v2559_v2 = vpop.f32.mrb[68].mxu0 }
 0x2ee   : > { %v1537_v3 = vadd.f32 %v2559_v2, %v3031_v55  ;;  %v1528_v4 = vpop.f32.mrb[69].mxu0 }
 0x2ef   : > { %v1529_v5 = vadd.f32 %v3031_v55, %v1528_v4  ;;  %v2560_v6 = vpop.f32.mrb[70].mxu0 }
 0x2f0   : > { %1677 = vst.msk [vmem:[%s3035_s10 + $0x130] sm:$0xff] %vm344_vm1, %v1537_v3  ;;  %v1540_v7 = vadd.f32 %v2560_v6, %v3031_v55  ;;  %v1531_v8 = vpop.f32.mrb[71].mxu0 }
 0x2f1   : > { %1675 = vst.msk [vmem:[%s3035_s10 + $0x120] sm:$0xff] %vm344_vm1, %v1529_v5  ;;  %v1532_v9 = vadd.f32 %v3031_v55, %v1531_v8 }
 0x2f2   : > { %1678 = vst.msk [vmem:[%s3035_s10 + $0x138] sm:$0xff] %vm344_vm1, %v1540_v7 }
 0x2f3   : > { %1676 = vst.msk [vmem:[%s3035_s10 + $0x128] sm:$0xff] %vm344_vm1, %v1532_v9 }
 0x2f5   : > { %v2563_v11 = vpop.f32.mrb[72].mxu0 }
 0x2f6   : > { %v1553_v15 = vadd.f32 %v2563_v11, %v3031_v55  ;;  %v1544_v16 = vpop.f32.mrb[73].mxu0 }
 0x2f7   : > { %v1545_v17 = vadd.f32 %v3031_v55, %v1544_v16  ;;  %v2564_v18 = vpop.f32.mrb[74].mxu0 }
 0x2f8   : > { %1681 = vst.msk [vmem:[%s3035_s10 + $0x150] sm:$0xff] %vm344_vm1, %v1553_v15  ;;  %v1556_v19 = vadd.f32 %v2564_v18, %v3031_v55  ;;  %v1547_v20 = vpop.f32.mrb[75].mxu0 }
 0x2f9   : > { %1679 = vst.msk [vmem:[%s3035_s10 + $0x140] sm:$0xff] %vm344_vm1, %v1545_v17  ;;  %v1548_v21 = vadd.f32 %v3031_v55, %v1547_v20 }
 0x2fa   : > { %1682 = vst.msk [vmem:[%s3035_s10 + $0x158] sm:$0xff] %vm344_vm1, %v1556_v19 }
 0x2fb   : > { %1680 = vst.msk [vmem:[%s3035_s10 + $0x148] sm:$0xff] %vm344_vm1, %v1548_v21 }
 0x2fd   : > { %v2567_v22 = vpop.f32.mrb[76].mxu0 }
 0x2fe   : > { %v1569_v23 = vadd.f32 %v2567_v22, %v3031_v55  ;;  %v1560_v24 = vpop.f32.mrb[77].mxu0 }
 0x2ff   : > { %v1561_v25 = vadd.f32 %v3031_v55, %v1560_v24  ;;  %v2568_v26 = vpop.f32.mrb[78].mxu0 }
 0x300   : > { %1685 = vst.msk [vmem:[%s3035_s10 + $0x170] sm:$0xff] %vm344_vm1, %v1569_v23  ;;  %v1572_v14 = vadd.f32 %v2568_v26, %v3031_v55  ;;  %v1563_v12 = vpop.f32.mrb[79].mxu0 }
 0x301   : > { %1683 = vst.msk [vmem:[%s3035_s10 + $0x160] sm:$0xff] %vm344_vm1, %v1561_v25  ;;  %v1564_v34 = vadd.f32 %v3031_v55, %v1563_v12 }
 0x302   : > { %1686 = vst.msk [vmem:[%s3035_s10 + $0x178] sm:$0xff] %vm344_vm1, %v1572_v14 }
 0x303   : > { %1684 = vst.msk [vmem:[%s3035_s10 + $0x168] sm:$0xff] %vm344_vm1, %v1564_v34 }
 0x305   : > { %v2571_v36 = vpop.f32.mrb[80].mxu0 }
 0x306   : > { %v1585_v54 = vadd.f32 %v2571_v36, %v3031_v55  ;;  %v1576_v56 = vpop.f32.mrb[81].mxu0 }
 0x307   : > { %v1577_v13 = vadd.f32 %v3031_v55, %v1576_v56  ;;  %v2572_v27 = vpop.f32.mrb[82].mxu0 }
 0x308   : > { %1689 = vst.msk [vmem:[%s3035_s10 + $0x190] sm:$0xff] %vm344_vm1, %v1585_v54  ;;  %v1588_v28 = vadd.f32 %v2572_v27, %v3031_v55  ;;  %v1579_v29 = vpop.f32.mrb[83].mxu0 }
 0x309   : > { %1687 = vst.msk [vmem:[%s3035_s10 + $0x180] sm:$0xff] %vm344_vm1, %v1577_v13  ;;  %v1580_v10 = vadd.f32 %v3031_v55, %v1579_v29 }
 0x30a   : > { %1690 = vst.msk [vmem:[%s3035_s10 + $0x198] sm:$0xff] %vm344_vm1, %v1588_v28 }
 0x30b   : > { %1688 = vst.msk [vmem:[%s3035_s10 + $0x188] sm:$0xff] %vm344_vm1, %v1580_v10 }
 0x30d   : > { %v2575_v30 = vpop.f32.mrb[84].mxu0 }
 0x30e   : > { %v1601_v31 = vadd.f32 %v2575_v30, %v3031_v55  ;;  %v1592_v32 = vpop.f32.mrb[85].mxu0 }
 0x30f   : > { %v1593_v33 = vadd.f32 %v3031_v55, %v1592_v32  ;;  %v2576_v35 = vpop.f32.mrb[86].mxu0 }
 0x310   : > { %1693 = vst.msk [vmem:[%s3035_s10 + $0x1b0] sm:$0xff] %vm344_vm1, %v1601_v31  ;;  %v1604_v37 = vadd.f32 %v2576_v35, %v3031_v55  ;;  %v1595_v38 = vpop.f32.mrb[87].mxu0 }
 0x311   : > { %1691 = vst.msk [vmem:[%s3035_s10 + $0x1a0] sm:$0xff] %vm344_vm1, %v1593_v33  ;;  %v1596_v39 = vadd.f32 %v3031_v55, %v1595_v38 }
 0x312   : > { %1694 = vst.msk [vmem:[%s3035_s10 + $0x1b8] sm:$0xff] %vm344_vm1, %v1604_v37 }
 0x313   : > { %1692 = vst.msk [vmem:[%s3035_s10 + $0x1a8] sm:$0xff] %vm344_vm1, %v1596_v39 }
 0x315   : > { %v2579_v40 = vpop.f32.mrb[88].mxu0 }
 0x316   : > { %v1617_v41 = vadd.f32 %v2579_v40, %v3031_v55  ;;  %v1608_v42 = vpop.f32.mrb[89].mxu0 }
 0x317   : > { %v1609_v43 = vadd.f32 %v3031_v55, %v1608_v42  ;;  %v2580_v44 = vpop.f32.mrb[90].mxu0 }
 0x318   : > { %1697 = vst.msk [vmem:[%s3035_s10 + $0x1d0] sm:$0xff] %vm344_vm1, %v1617_v41  ;;  %v1620_v45 = vadd.f32 %v2580_v44, %v3031_v55  ;;  %v1611_v46 = vpop.f32.mrb[91].mxu0 }
 0x319   : > { %1695 = vst.msk [vmem:[%s3035_s10 + $0x1c0] sm:$0xff] %vm344_vm1, %v1609_v43  ;;  %v1612_v47 = vadd.f32 %v3031_v55, %v1611_v46 }
 0x31a   : > { %1698 = vst.msk [vmem:[%s3035_s10 + $0x1d8] sm:$0xff] %vm344_vm1, %v1620_v45 }
 0x31b   : > { %1696 = vst.msk [vmem:[%s3035_s10 + $0x1c8] sm:$0xff] %vm344_vm1, %v1612_v47 }
 0x31d   : > { %v2583_v48 = vpop.f32.mrb[92].mxu0  ;;  %1709 = sbr.rel (!%p2836_p4) target bundleno = 876 (0x36c), region = 44 }
 0x31e   : > { %v1633_v49 = vadd.f32 %v2583_v48, %v3031_v55  ;;  %v1624_v50 = vpop.f32.mrb[93].mxu0 }
 0x31f   : > { %v1625_v51 = vadd.f32 %v3031_v55, %v1624_v50  ;;  %v2584_v52 = vpop.f32.mrb[94].mxu0 }
 0x320   : > { %1701 = vst.msk [vmem:[%s3035_s10 + $0x1f0] sm:$0xff] %vm344_vm1, %v1633_v49  ;;  %v1636_v53 = vadd.f32 %v2584_v52, %v3031_v55  ;;  %v1627_v57 = vpop.f32.mrb[95].mxu0 }
 0x321   : > { %1699 = vst.msk [vmem:[%s3035_s10 + $0x1e0] sm:$0xff] %vm344_vm1, %v1625_v51  ;;  %v1628_v58 = vadd.f32 %v3031_v55, %v1627_v57 }
 0x322   : > { %1702 = vst.msk [vmem:[%s3035_s10 + $0x1f8] sm:$0xff] %vm344_vm1, %v1636_v53 }
 0x323   : > { %1700 = vst.msk [vmem:[%s3035_s10 + $0x1e8] sm:$0xff] %vm344_vm1, %v1628_v58 }
 0x324   : > { %s3449_s18 = smov (!%p1712_p8, %s1711_s18), 64 }
 0x325   : > { %s2228_s15 = sshll.u32 %s3449_s18, 7 }
 0x326   : > { %p2231_p9 = scmp.eq.s32.totalorder %s2228_s15, 0 }
 0x327   : > { %s3240_s16 = sshrl.u32 (!%p2231_p9), %s3449_s18, 6 }
 0x328   : > { %1720 = sbr.rel (%p2231_p9) target bundleno = 876 (0x36c), region = 48  ;;  %p2232_p10 = scmp.le.s32.totalorder (!%p2231_p9), %s3240_s16, 0 }
 0x32f   : > { %2126 = sbr.rel (%p2232_p10) target bundleno = 855 (0x357), region = 124  ;;  %s3440_s21 = smov (!%p2232_p10), %s3234_s14 }
 0x330   : > { %s3441_s26 = smov (!%p2232_p10), %s3035_s10  ;;  %s3249_s29 = smov (!%p2232_p10), 0  }
 0x331   : > { %s3251_s17 = smov (!%p2232_p10), 0  }
 0x336 LB: >> { %v1908_v55 = vld [vmem:[%s2755_s26] sm:$0xff]  ;;  %v1910_v59 = vld [vmem:[%s2755_s26 + $0x8] sm:$0xff]  ;;  %v1912_v60 = vld [vmem:[%s2755_s26 + $0x10] sm:$0xff]  ;;  %s2036_s20 = sadd.s32 1, %s2759_s29  ;;  %s1902_s17 = sadd.s32 1, %s2763_s17   ;;  %s2763_s17 = sphi %s3251_s17, %s1902_s17   ;;  %s2759_s29 = sphi %s3249_s29, %s3444_s29   ;;  %s2755_s26 = sphi %s3441_s26, %s3443_s26   ;;  %s2751_s21 = sphi %s3440_s21, %s3442_s21  }
 0x337   : >> { %1909 = vst [vmem:[%s2751_s21] sm:$0xff] %v1908_v55  ;;  %1911 = vst [vmem:[%s2751_s21 + $0x8] sm:$0xff] %v1910_v59  ;;  %v1914_v61 = vld [vmem:[%s2755_s26 + $0x18] sm:$0xff]  ;;  %v1916_v62 = vld [vmem:[%s2755_s26 + $0x20] sm:$0xff]  ;;  %p2037_p11 = scmp.ge.s32.totalorder %s2036_s20, %s3240_s16  ;;  %p1901_p12 = scmp.ge.s32.totalorder %s1902_s17, %s3240_s16 }
 0x338   : >> { %1913 = vst [vmem:[%s2751_s21 + $0x10] sm:$0xff] %v1912_v60  ;;  %v1918_v63 = vld [vmem:[%s2755_s26 + $0x28] sm:$0xff]  ;;  %1915 = vst [vmem:[%s2751_s21 + $0x18] sm:$0xff] %v1914_v61  ;;  %v1920_v0 = vld [vmem:[%s2755_s26 + $0x30] sm:$0xff] }
 0x339   : >> { %1917 = vst [vmem:[%s2751_s21 + $0x20] sm:$0xff] %v1916_v62  ;;  %1919 = vst [vmem:[%s2751_s21 + $0x28] sm:$0xff] %v1918_v63  ;;  %v1922_v1 = vld [vmem:[%s2755_s26 + $0x38] sm:$0xff]  ;;  %v1924_v2 = vld [vmem:[%s2755_s26 + $0x40] sm:$0xff]  ;;  %s3451_s20 = smov (%p2037_p11, %s2036_s20), 0 }
 0x33a   : >> { %1921 = vst [vmem:[%s2751_s21 + $0x30] sm:$0xff] %v1920_v0  ;;  %1923 = vst [vmem:[%s2751_s21 + $0x38] sm:$0xff] %v1922_v1  ;;  %v1926_v3 = vld [vmem:[%s2755_s26 + $0x48] sm:$0xff]  ;;  %v1928_v4 = vld [vmem:[%s2755_s26 + $0x50] sm:$0xff]  ;;  %s2233_s23 = sshll.u32 %s3451_s20, 9  ;;  %s3444_s29 = smov %s3451_s20 }
 0x33b   : >> { %1925 = vst [vmem:[%s2751_s21 + $0x40] sm:$0xff] %v1924_v2  ;;  %v1930_v5 = vld [vmem:[%s2755_s26 + $0x58] sm:$0xff]  ;;  %1927 = vst [vmem:[%s2751_s21 + $0x48] sm:$0xff] %v1926_v3  ;;  %v1932_v6 = vld [vmem:[%s2755_s26 + $0x60] sm:$0xff]  ;;  %s3307_s24 = scalar_lea.vmem %s3035_s10, %s2233_s23 [#allocation2]   ;;  %s3310_s27 = scalar_lea.vmem %s3234_s14, %s2233_s23  }
 0x33c   : >> { %1929 = vst [vmem:[%s2751_s21 + $0x50] sm:$0xff] %v1928_v4  ;;  %1931 = vst [vmem:[%s2751_s21 + $0x58] sm:$0xff] %v1930_v5  ;;  %v1934_v7 = vld [vmem:[%s2755_s26 + $0x68] sm:$0xff]  ;;  %v1936_v8 = vld [vmem:[%s2755_s26 + $0x70] sm:$0xff] }
 0x33d   : >> { %1933 = vst [vmem:[%s2751_s21 + $0x60] sm:$0xff] %v1932_v6  ;;  %1935 = vst [vmem:[%s2751_s21 + $0x68] sm:$0xff] %v1934_v7  ;;  %v1938_v9 = vld [vmem:[%s2755_s26 + $0x78] sm:$0xff]  ;;  %v1940_v11 = vld [vmem:[%s2755_s26 + $0x80] sm:$0xff] }
 0x33e   : >> { %1937 = vst [vmem:[%s2751_s21 + $0x70] sm:$0xff] %v1936_v8  ;;  %v1942_v15 = vld [vmem:[%s2755_s26 + $0x88] sm:$0xff]  ;;  %1939 = vst [vmem:[%s2751_s21 + $0x78] sm:$0xff] %v1938_v9  ;;  %v1944_v16 = vld [vmem:[%s2755_s26 + $0x90] sm:$0xff] }
 0x33f   : >> { %1941 = vst [vmem:[%s2751_s21 + $0x80] sm:$0xff] %v1940_v11  ;;  %1943 = vst [vmem:[%s2751_s21 + $0x88] sm:$0xff] %v1942_v15  ;;  %v1946_v17 = vld [vmem:[%s2755_s26 + $0x98] sm:$0xff]  ;;  %v1948_v18 = vld [vmem:[%s2755_s26 + $0xa0] sm:$0xff] }
 0x340   : >> { %1945 = vst [vmem:[%s2751_s21 + $0x90] sm:$0xff] %v1944_v16  ;;  %1947 = vst [vmem:[%s2751_s21 + $0x98] sm:$0xff] %v1946_v17  ;;  %v1950_v19 = vld [vmem:[%s2755_s26 + $0xa8] sm:$0xff]  ;;  %v1952_v20 = vld [vmem:[%s2755_s26 + $0xb0] sm:$0xff] }
 0x341   : >> { %1949 = vst [vmem:[%s2751_s21 + $0xa0] sm:$0xff] %v1948_v18  ;;  %v1954_v21 = vld [vmem:[%s2755_s26 + $0xb8] sm:$0xff]  ;;  %1951 = vst [vmem:[%s2751_s21 + $0xa8] sm:$0xff] %v1950_v19  ;;  %v1956_v22 = vld [vmem:[%s2755_s26 + $0xc0] sm:$0xff] }
 0x342   : >> { %1953 = vst [vmem:[%s2751_s21 + $0xb0] sm:$0xff] %v1952_v20  ;;  %1955 = vst [vmem:[%s2751_s21 + $0xb8] sm:$0xff] %v1954_v21  ;;  %v1958_v23 = vld [vmem:[%s2755_s26 + $0xc8] sm:$0xff]  ;;  %v1960_v24 = vld [vmem:[%s2755_s26 + $0xd0] sm:$0xff] }
 0x343   : >> { %1957 = vst [vmem:[%s2751_s21 + $0xc0] sm:$0xff] %v1956_v22  ;;  %1959 = vst [vmem:[%s2751_s21 + $0xc8] sm:$0xff] %v1958_v23  ;;  %v1962_v25 = vld [vmem:[%s2755_s26 + $0xd8] sm:$0xff]  ;;  %v1964_v26 = vld [vmem:[%s2755_s26 + $0xe0] sm:$0xff] }
 0x344   : >> { %1961 = vst [vmem:[%s2751_s21 + $0xd0] sm:$0xff] %v1960_v24  ;;  %v1966_v14 = vld [vmem:[%s2755_s26 + $0xe8] sm:$0xff]  ;;  %1963 = vst [vmem:[%s2751_s21 + $0xd8] sm:$0xff] %v1962_v25  ;;  %v1968_v12 = vld [vmem:[%s2755_s26 + $0xf0] sm:$0xff] }
 0x345   : >> { %1965 = vst [vmem:[%s2751_s21 + $0xe0] sm:$0xff] %v1964_v26  ;;  %1967 = vst [vmem:[%s2751_s21 + $0xe8] sm:$0xff] %v1966_v14  ;;  %v1970_v34 = vld [vmem:[%s2755_s26 + $0xf8] sm:$0xff]  ;;  %v1972_v36 = vld [vmem:[%s2755_s26 + $0x100] sm:$0xff] }
 0x346   : >> { %1969 = vst [vmem:[%s2751_s21 + $0xf0] sm:$0xff] %v1968_v12  ;;  %1971 = vst [vmem:[%s2751_s21 + $0xf8] sm:$0xff] %v1970_v34  ;;  %v1974_v54 = vld [vmem:[%s2755_s26 + $0x108] sm:$0xff]  ;;  %v1976_v56 = vld [vmem:[%s2755_s26 + $0x110] sm:$0xff] }
 0x347   : >> { %1973 = vst [vmem:[%s2751_s21 + $0x100] sm:$0xff] %v1972_v36  ;;  %v1978_v13 = vld [vmem:[%s2755_s26 + $0x118] sm:$0xff]  ;;  %1975 = vst [vmem:[%s2751_s21 + $0x108] sm:$0xff] %v1974_v54  ;;  %v1980_v27 = vld [vmem:[%s2755_s26 + $0x120] sm:$0xff] }
 0x348   : >> { %1977 = vst [vmem:[%s2751_s21 + $0x110] sm:$0xff] %v1976_v56  ;;  %1979 = vst [vmem:[%s2751_s21 + $0x118] sm:$0xff] %v1978_v13  ;;  %v1982_v28 = vld [vmem:[%s2755_s26 + $0x128] sm:$0xff]  ;;  %v1984_v29 = vld [vmem:[%s2755_s26 + $0x130] sm:$0xff] }
 0x349   : >> { %1981 = vst [vmem:[%s2751_s21 + $0x120] sm:$0xff] %v1980_v27  ;;  %1983 = vst [vmem:[%s2751_s21 + $0x128] sm:$0xff] %v1982_v28  ;;  %v1986_v10 = vld [vmem:[%s2755_s26 + $0x138] sm:$0xff]  ;;  %v1988_v30 = vld [vmem:[%s2755_s26 + $0x140] sm:$0xff] }
 0x34a   : >> { %1985 = vst [vmem:[%s2751_s21 + $0x130] sm:$0xff] %v1984_v29  ;;  %v1990_v31 = vld [vmem:[%s2755_s26 + $0x148] sm:$0xff]  ;;  %1987 = vst [vmem:[%s2751_s21 + $0x138] sm:$0xff] %v1986_v10  ;;  %v1992_v32 = vld [vmem:[%s2755_s26 + $0x150] sm:$0xff] }
 0x34b   : >> { %1989 = vst [vmem:[%s2751_s21 + $0x140] sm:$0xff] %v1988_v30  ;;  %1991 = vst [vmem:[%s2751_s21 + $0x148] sm:$0xff] %v1990_v31  ;;  %v1994_v33 = vld [vmem:[%s2755_s26 + $0x158] sm:$0xff]  ;;  %v1996_v35 = vld [vmem:[%s2755_s26 + $0x160] sm:$0xff] }
 0x34c   : >> { %1993 = vst [vmem:[%s2751_s21 + $0x150] sm:$0xff] %v1992_v32  ;;  %1995 = vst [vmem:[%s2751_s21 + $0x158] sm:$0xff] %v1994_v33  ;;  %v1998_v37 = vld [vmem:[%s2755_s26 + $0x168] sm:$0xff]  ;;  %v2000_v38 = vld [vmem:[%s2755_s26 + $0x170] sm:$0xff] }
 0x34d   : >> { %1997 = vst [vmem:[%s2751_s21 + $0x160] sm:$0xff] %v1996_v35  ;;  %v2002_v39 = vld [vmem:[%s2755_s26 + $0x178] sm:$0xff]  ;;  %1999 = vst [vmem:[%s2751_s21 + $0x168] sm:$0xff] %v1998_v37  ;;  %v2004_v40 = vld [vmem:[%s2755_s26 + $0x180] sm:$0xff] }
 0x34e   : >> { %2001 = vst [vmem:[%s2751_s21 + $0x170] sm:$0xff] %v2000_v38  ;;  %2003 = vst [vmem:[%s2751_s21 + $0x178] sm:$0xff] %v2002_v39  ;;  %v2006_v41 = vld [vmem:[%s2755_s26 + $0x188] sm:$0xff]  ;;  %v2008_v42 = vld [vmem:[%s2755_s26 + $0x190] sm:$0xff] }
 0x34f   : >> { %2005 = vst [vmem:[%s2751_s21 + $0x180] sm:$0xff] %v2004_v40  ;;  %2007 = vst [vmem:[%s2751_s21 + $0x188] sm:$0xff] %v2006_v41  ;;  %v2010_v43 = vld [vmem:[%s2755_s26 + $0x198] sm:$0xff]  ;;  %v2012_v44 = vld [vmem:[%s2755_s26 + $0x1a0] sm:$0xff] }
 0x350   : >> { %2009 = vst [vmem:[%s2751_s21 + $0x190] sm:$0xff] %v2008_v42  ;;  %v2014_v45 = vld [vmem:[%s2755_s26 + $0x1a8] sm:$0xff]  ;;  %2011 = vst [vmem:[%s2751_s21 + $0x198] sm:$0xff] %v2010_v43  ;;  %v2016_v46 = vld [vmem:[%s2755_s26 + $0x1b0] sm:$0xff]  ;;  %1904 = sbr.rel (!%p1901_p12) target bundleno = 822 (0x336), region = 130 }
 0x351   : >> { %2013 = vst [vmem:[%s2751_s21 + $0x1a0] sm:$0xff] %v2012_v44  ;;  %2015 = vst [vmem:[%s2751_s21 + $0x1a8] sm:$0xff] %v2014_v45  ;;  %v2018_v47 = vld [vmem:[%s2755_s26 + $0x1b8] sm:$0xff]  ;;  %v2020_v48 = vld [vmem:[%s2755_s26 + $0x1c0] sm:$0xff] }
 0x352   : >> { %2017 = vst [vmem:[%s2751_s21 + $0x1b0] sm:$0xff] %v2016_v46  ;;  %2019 = vst [vmem:[%s2751_s21 + $0x1b8] sm:$0xff] %v2018_v47  ;;  %v2022_v49 = vld [vmem:[%s2755_s26 + $0x1c8] sm:$0xff]  ;;  %v2024_v50 = vld [vmem:[%s2755_s26 + $0x1d0] sm:$0xff] }
 0x353   : >> { %2021 = vst [vmem:[%s2751_s21 + $0x1c0] sm:$0xff] %v2020_v48  ;;  %v2026_v51 = vld [vmem:[%s2755_s26 + $0x1d8] sm:$0xff]  ;;  %2023 = vst [vmem:[%s2751_s21 + $0x1c8] sm:$0xff] %v2022_v49  ;;  %v2028_v52 = vld [vmem:[%s2755_s26 + $0x1e0] sm:$0xff] }
 0x354   : >> { %2025 = vst [vmem:[%s2751_s21 + $0x1d0] sm:$0xff] %v2024_v50  ;;  %2027 = vst [vmem:[%s2751_s21 + $0x1d8] sm:$0xff] %v2026_v51  ;;  %v2030_v53 = vld [vmem:[%s2755_s26 + $0x1e8] sm:$0xff]  ;;  %v2032_v57 = vld [vmem:[%s2755_s26 + $0x1f0] sm:$0xff] }
 0x355   : >> { %2029 = vst [vmem:[%s2751_s21 + $0x1e0] sm:$0xff] %v2028_v52  ;;  %2031 = vst [vmem:[%s2751_s21 + $0x1e8] sm:$0xff] %v2030_v53  ;;  %v2034_v58 = vld [vmem:[%s2755_s26 + $0x1f8] sm:$0xff]  ;;  %s3443_s26 = smov %s3307_s24 }
 0x356   : >> { %2033 = vst [vmem:[%s2751_s21 + $0x1f0] sm:$0xff] %v2032_v57  ;;  %2035 = vst [vmem:[%s2751_s21 + $0x1f8] sm:$0xff] %v2034_v58  ;;  %s3442_s21 = smov %s3310_s27 }
 0x357 PF: > { %s3415_s28 = sand.u32 63, %s3449_s18   ;;  %s2244_s30 = sshll.u32 %s3240_s16, 9 }
 0x358   : > { %s2047_s6 = scalar_lea.vmem %s3035_s10, %s2244_s30 [#allocation2]   ;;  %s2049_s7 = scalar_lea.vmem %s3234_s14, %s2244_s30  }
 0x359   : > { %p2238_p13 = scmp.le.s32.totalorder %s3415_s28, 0 }
 0x35a   : > { %s2765_s8 = smov (!%p2238_p13), %s2049_s7   ;;  %s2769_s9 = smov (!%p2238_p13), %s2047_s6  }
 0x35b   : > { %2140 = sbr.rel (%p2238_p13) target bundleno = 876 (0x36c), region = 135  ;;  %s2773_s12 = smov (!%p2238_p13), 0  }
 0x35c   : > { %s2777_s11 = smov (!%p2238_p13), 0  }
 0x362 LB: >> { %v2059_v55 = vld [vmem:[%s2771_s9] sm:$0xff]  ;;  %s2061_s18 = sadd.s32 1, %s2775_s12  ;;  %s2053_s11 = sadd.s32 1, %s2779_s11   ;;  %s2779_s11 = sphi %s2777_s11, %s2053_s11   ;;  %s2775_s12 = sphi %s2773_s12, %s2774_s12   ;;  %s2771_s9 = sphi %s2769_s9, %s2066_s9   ;;  %s2767_s8 = sphi %s2765_s8, %s2067_s8  }
 0x363   : >> { %2060 = vst [vmem:[%s2767_s8] sm:$0xff] %v2059_v55  ;;  %p2062_p0 = scmp.ge.s32.totalorder %s2061_s18, %s3415_s28  ;;  %p2052_p1 = scmp.ge.s32.totalorder %s2053_s11, %s3415_s28 }
 0x365   : >> { %s3453_s18 = smov (%p2062_p0, %s2061_s18), 0  ;;  %2055 = sbr.rel (!%p2052_p1) target bundleno = 866 (0x362), region = 141 }
 0x366   : >> { %s2239_s10 = sshll.u32 %s3453_s18, 3  ;;  %s2774_s12 = smov %s3453_s18  }
 0x367   : >> { %s2066_s9 = scalar_lea.vmem %s2047_s6, %s2239_s10 [#allocation2]   ;;  %s2067_s8 = scalar_lea.vmem %s2049_s7, %s2239_s10  }
 0x36c PF: > { %p12_p2 = scmp.ge.s32.totalorder %s2826_s22, 4   ;;  %s3445_s18 = smov %s2743_s19 }
 0x36d   : > { %s3446_s19 = smov %s2834_s25  ;;  %s3447_s20 = smov %s2826_s22 }
 0x36e   :  { %14 = sbr.rel (!%p12_p2) target bundleno = 2 (0x2), region = 152 }

</bundles_post_ra>
